<compile_context>
chip_gen: v7x
topology: tpu7x:2x2x1
jax: 0.10.0
libtpu: 0.0.40
codegen_flags: <defaults>
</compile_context>

<pallas_src>
import functools
import jax
import jax.numpy as jnp
from jax.experimental import pallas as pl
from jax.experimental.pallas import tpu as pltpu


def sanm_attn_kernel(x_ref, mcol_ref, mrow_ref,
                     wqkv_ref, bqkv_ref, wfsmn_ref, wout_ref, bout_ref,
                     o_ref,
                     q_s, k_s, v_s, vpad_s, att_s,
                     *, T, TQ, NF, H, DK, K, LEFT, PAD0):
    qi = pl.program_id(1)

    # ---- per-batch init (first query tile of each batch): fused QKV projection
    #      into sequence-resident bf16 VMEM scratch. Scale already folded into W_qkv.
    @pl.when(qi == 0)
    def _():
        x = x_ref[0].astype(jnp.bfloat16)                       # (T, IN)
        qkv = jnp.dot(x, wqkv_ref[...],
                      preferred_element_type=jnp.float32) + bqkv_ref[...]
        q_s[...] = qkv[:, 0 * NF:1 * NF].astype(jnp.bfloat16)   # pre-scaled q
        k_s[...] = qkv[:, 1 * NF:2 * NF].astype(jnp.bfloat16)
        vm = qkv[:, 2 * NF:3 * NF] * mcol_ref[0]                # masked value (T, NF) f32
        v_s[...] = vm.astype(jnp.bfloat16)
        vpad_s[...] = jnp.zeros_like(vpad_s)                    # zero halo rows
        vpad_s[pl.ds(PAD0, T), :] = vm                          # sublane-aligned store

    q0 = pl.multiple_of(qi * TQ, TQ)

    # ---- FSMN depthwise conv: K shifted taps over the zero-padded value buffer ----
    conv = jnp.zeros((TQ, NF), jnp.float32)
    for j in range(K):                                          # K small -> unrolled taps
        conv = conv + vpad_s[pl.ds(q0 + j + PAD0 - LEFT, TQ), :] * wfsmn_ref[j]
    vm_tile = vpad_s[pl.ds(q0 + PAD0, TQ), :]                   # masked v rows of this tile
    mcol_tile = mcol_ref[0, pl.ds(q0, TQ), :]                   # (TQ, 1)
    fsmn = (conv + vm_tile) * mcol_tile                         # dropout = identity (eval)

    # ---- multi-head attention for this query tile ----
    key_pad = mrow_ref[0] == 0.0                                # (1, T) masked keys
    for h in range(H):
        lo = h * DK
        qh = q_s[pl.ds(q0, TQ), lo:lo + DK]                     # (TQ, DK) bf16, pre-scaled
        kh = k_s[:, lo:lo + DK]                                  # (T, DK)  bf16
        vh = v_s[:, lo:lo + DK]                                  # (T, DK)  bf16
        s = jnp.einsum("qd,kd->qk", qh, kh,
                       preferred_element_type=jnp.float32)       # (TQ, T) f32
        s = jnp.where(key_pad, -1e30, s)                         # finite sentinel: NaN-safe
        m = jnp.max(s, axis=-1, keepdims=True)
        e = jnp.exp(s - m)
        p = e * pl.reciprocal(jnp.sum(e, axis=-1, keepdims=True), approx=True)
        p = jnp.where(key_pad, 0.0, p)                           # dropout = identity (eval)
        # write each head's P@V straight into the lane slab of the (TQ, NF) scratch
        att_s[:, lo:lo + DK] = jnp.dot(
            p.astype(jnp.bfloat16), vh,
            preferred_element_type=jnp.float32).astype(jnp.bfloat16)

    # ---- linear_out + FSMN residual ----
    out = jnp.dot(att_s[...], wout_ref[...],
                  preferred_element_type=jnp.float32) + bout_ref[...]
    o_ref[0] = (out + fsmn).astype(o_ref.dtype)


def sanm_attention(x, mask, params, *, n_head, kernel_size, sanm_shift=0, tq=None):
    B, T, IN = x.shape
    NF = params["wout"].shape[0]
    H = n_head
    DK = NF // H
    K = kernel_size
    LEFT = (K - 1) // 2 + (sanm_shift if sanm_shift > 0 else 0)
    RIGHT = K - 1 - LEFT
    PAD0 = ((LEFT + 7) // 8) * 8                 # sublane-aligned left halo

    if tq is None:
        tq = min(T, 256)
    assert T % tq == 0 and tq % 8 == 0

    # Fold the d_k**-0.5 query scale into the projection params (free, param-prep time)
    # and cast matmul weights to bf16 for native MXU rate (f32 accumulation in-kernel).
    scale = DK ** (-0.5)
    wqkv = jnp.concatenate([params["wqkv"][:, :NF] * scale, params["wqkv"][:, NF:]], axis=1)
    bqkv = jnp.concatenate([params["bqkv"][:, :NF] * scale, params["bqkv"][:, NF:]], axis=1)
    wqkv_bf = wqkv.astype(jnp.bfloat16)
    wout_bf = params["wout"].astype(jnp.bfloat16)

    mask_col = mask.reshape(B, T, 1).astype(jnp.float32)    # query/value mask
    mask_row = mask.reshape(B, 1, T).astype(jnp.float32)    # key mask

    kernel = functools.partial(sanm_attn_kernel, T=T, TQ=tq, NF=NF, H=H,
                               DK=DK, K=K, LEFT=LEFT, PAD0=PAD0)

    return pl.pallas_call(
        kernel,
        out_shape=jax.ShapeDtypeStruct((B, T, NF), jnp.float32),
        grid_spec=pltpu.PrefetchScalarGridSpec(
            num_scalar_prefetch=0,
            grid=(B, T // tq),
            in_specs=[
                pl.BlockSpec((1, T, IN), lambda b, q: (b, 0, 0)),     # x (full seq / batch)
                pl.BlockSpec((1, T, 1), lambda b, q: (b, 0, 0)),      # mask (col)
                pl.BlockSpec((1, 1, T), lambda b, q: (b, 0, 0)),      # mask (row / keys)
                pl.BlockSpec((IN, 3 * NF), lambda b, q: (0, 0)),      # W_qkv (bf16, q-scaled)
                pl.BlockSpec((1, 3 * NF), lambda b, q: (0, 0)),       # b_qkv (q-scaled)
                pl.BlockSpec((K, NF), lambda b, q: (0, 0)),           # FSMN taps
                pl.BlockSpec((NF, NF), lambda b, q: (0, 0)),          # W_out (bf16)
                pl.BlockSpec((1, NF), lambda b, q: (0, 0)),           # b_out
            ],
            out_specs=pl.BlockSpec((1, tq, NF), lambda b, q: (b, q, 0)),
            scratch_shapes=[
                pltpu.VMEM((T, NF), jnp.bfloat16),                    # q (scaled)
                pltpu.VMEM((T, NF), jnp.bfloat16),                    # k
                pltpu.VMEM((T, NF), jnp.bfloat16),                    # masked v (P@V)
                pltpu.VMEM((PAD0 + T + RIGHT, NF), jnp.float32),      # padded v (FSMN)
                pltpu.VMEM((tq, NF), jnp.bfloat16),                   # per-tile att output
            ],
        ),
        compiler_params=pltpu.CompilerParams(
            dimension_semantics=("parallel", "arbitrary"),
            vmem_limit_bytes=48 * 1024 * 1024),
    )(x, mask_col, mask_row, wqkv_bf, bqkv, params["wfsmn"], wout_bf, params["bout"])


def ref_forward(x, mask, params, *, n_head, kernel_size, sanm_shift=0):
    """Pure-JAX f32 reference mirroring the PyTorch forward (eval mode)."""
    B, T, _ = x.shape
    NF = params["wout"].shape[0]
    H, DK = n_head, NF // n_head
    K = kernel_size
    LEFT = (K - 1) // 2 + (sanm_shift if sanm_shift > 0 else 0)
    RIGHT = K - 1 - LEFT

    qkv = x @ params["wqkv"] + params["bqkv"]
    q, k, v = jnp.split(qkv, 3, axis=-1)

    mcol = mask.reshape(B, T, 1).astype(jnp.float32)
    v_m = v * mcol
    vp = jnp.pad(v_m, ((0, 0), (LEFT, RIGHT), (0, 0)))
    conv = jnp.zeros_like(v_m)
    for j in range(K):
        conv = conv + vp[:, j:j + T, :] * params["wfsmn"][j]
    fsmn = (conv + v_m) * mcol

    qh = q.reshape(B, T, H, DK).transpose(0, 2, 1, 3) * DK ** (-0.5)
    kh = k.reshape(B, T, H, DK).transpose(0, 2, 1, 3)
    vh = v.reshape(B, T, H, DK).transpose(0, 2, 1, 3)
    scores = qh @ kh.transpose(0, 1, 3, 2)
    keym = (mask.reshape(B, 1, 1, T) == 0)
    scores = jnp.where(keym, -jnp.inf, scores)
    attn = jax.nn.softmax(scores, axis=-1)
    attn = jnp.where(keym, 0.0, attn)
    xo = (attn @ vh).transpose(0, 2, 1, 3).reshape(B, T, NF)
    return xo @ params["wout"] + params["bout"] + fsmn


if __name__ == "__main__":
    B, T = 2, 64
    IN_FEAT, N_FEAT, N_HEAD = 64, 128, 4
    KERNEL_SIZE, SANM_SHIFT = 11, 0
    TQ = 32                                   # 2 query tiles -> exercises tiling + halo

    key = jax.random.PRNGKey(0)
    kx, kq, kbq, kf, ko, kbo = jax.random.split(key, 6)

    x = jax.random.normal(kx, (B, T, IN_FEAT), jnp.float32)
    # key/query padding mask (B, 1, T) in PyTorch -> passed as (B, T); lengths [64, 48]
    lengths = jnp.array([64, 48])
    mask = (jnp.arange(T)[None, :] < lengths[:, None]).astype(jnp.float32)

    # Deterministic synthetic parameters (PyTorch Linear weight is (out, in);
    # we store the transposed (in, out) for x @ W + b; Conv1d depthwise weight
    # (n_feat, 1, K) is stored as (K, n_feat)).
    params = {
        "wqkv": 0.1 * jax.random.normal(kq, (IN_FEAT, 3 * N_FEAT), jnp.float32),
        "bqkv": 0.1 * jax.random.normal(kbq, (1, 3 * N_FEAT), jnp.float32),
        "wfsmn": 0.1 * jax.random.normal(kf, (KERNEL_SIZE, N_FEAT), jnp.float32),
        "wout": 0.1 * jax.random.normal(ko, (N_FEAT, N_FEAT), jnp.float32),
        "bout": 0.1 * jax.random.normal(kbo, (1, N_FEAT), jnp.float32),
    }

    out = sanm_attention(x, mask, params, n_head=N_HEAD,
                         kernel_size=KERNEL_SIZE, sanm_shift=SANM_SHIFT, tq=TQ)
    out = jax.block_until_ready(out)

    ref = ref_forward(x, mask, params, n_head=N_HEAD,
                      kernel_size=KERNEL_SIZE, sanm_shift=SANM_SHIFT)
    assert out.shape == (B, T, N_FEAT)
    # Tolerance accounts for bf16 MXU operands (f32 accumulation) vs. the f32 reference.
    assert jnp.allclose(out, ref, atol=6e-2, rtol=6e-2), "mismatch vs JAX reference"

    print("KERNEL_OK")
</pallas_src>

<mosaic_0001>
module attributes {stable_mosaic.version = 11 : i64} {
  func.func @sanm_attn_kernel(%arg0: i32, %arg1: i32, %arg2: memref<1x64x64xf32, #tpu.memory_space<vmem>>, %arg3: memref<1x64x1xf32, #tpu.memory_space<vmem>>, %arg4: memref<1x1x64xf32, #tpu.memory_space<vmem>>, %arg5: memref<64x384xbf16, #tpu.memory_space<vmem>>, %arg6: memref<1x384xf32, #tpu.memory_space<vmem>>, %arg7: memref<11x128xf32, #tpu.memory_space<vmem>>, %arg8: memref<128x128xbf16, #tpu.memory_space<vmem>>, %arg9: memref<1x128xf32, #tpu.memory_space<vmem>>, %arg10: memref<1x32x128xf32, #tpu.memory_space<vmem>>, %arg11: memref<64x128xbf16, #tpu.memory_space<vmem>>, %arg12: memref<64x128xbf16, #tpu.memory_space<vmem>>, %arg13: memref<64x128xbf16, #tpu.memory_space<vmem>>, %arg14: memref<77x128xf32, #tpu.memory_space<vmem>>, %arg15: memref<32x128xbf16, #tpu.memory_space<vmem>>) attributes {dimension_semantics = [#tpu.dimension_semantics<parallel>, #tpu.dimension_semantics<arbitrary>], iteration_bounds = array<i64: 2, 2>, scalar_prefetch = 0 : i64, scratch_operands = 5 : i64, tpu.core_type = #tpu.core_type<tc>, window_params = [{transform_indices = @transform_0, window_bounds = array<i64: 1, 64, 64>}, {transform_indices = @transform_1, window_bounds = array<i64: 1, 64, 1>}, {transform_indices = @transform_2, window_bounds = array<i64: 1, 1, 64>}, {pipeline_mode = #tpu.pipeline_mode<synchronous>, transform_indices = @transform_3, window_bounds = array<i64: 64, 384>}, {pipeline_mode = #tpu.pipeline_mode<synchronous>, transform_indices = @transform_4, window_bounds = array<i64: 1, 384>}, {pipeline_mode = #tpu.pipeline_mode<synchronous>, transform_indices = @transform_5, window_bounds = array<i64: 11, 128>}, {pipeline_mode = #tpu.pipeline_mode<synchronous>, transform_indices = @transform_6, window_bounds = array<i64: 128, 128>}, {pipeline_mode = #tpu.pipeline_mode<synchronous>, transform_indices = @transform_7, window_bounds = array<i64: 1, 128>}, {transform_indices = @transform_8, window_bounds = array<i64: 1, 32, 128>}]} {
    %c0_i32 = arith.constant 0 : i32
    %0 = arith.cmpi eq, %arg1, %c0_i32 : i32
    %1 = arith.extui %0 : i1 to i32
    %c0_i32_0 = arith.constant 0 : i32
    %2 = arith.cmpi ne, %1, %c0_i32_0 : i32
    scf.if %2 {
      %c0_113 = arith.constant 0 : index
      %c0_114 = arith.constant 0 : index
      %c0_115 = arith.constant 0 : index
      %258 = vector.load %arg2[%c0_113, %c0_114, %c0_115] : memref<1x64x64xf32, #tpu.memory_space<vmem>>, vector<1x64x64xf32>
      %259 = vector.shape_cast %258 : vector<1x64x64xf32> to vector<64x64xf32>
      %260 = arith.truncf %259 : vector<64x64xf32> to vector<64x64xbf16>
      %c0_116 = arith.constant 0 : index
      %c0_117 = arith.constant 0 : index
      %261 = vector.load %arg5[%c0_116, %c0_117] : memref<64x384xbf16, #tpu.memory_space<vmem>>, vector<64x384xbf16>
      %cst_118 = arith.constant dense<0.000000e+00> : vector<64x384xf32>
      %262 = tpu.matmul %260, %261, %cst_118 {dimension_numbers = #tpu.dot_dimension_numbers<[1], [0], [0], [1], [0, 0, 1, 1], [], []>} : vector<64x64xbf16>, vector<64x384xbf16>, vector<64x384xf32> -> vector<64x384xf32>
      %c0_119 = arith.constant 0 : index
      %c0_120 = arith.constant 0 : index
      %263 = vector.load %arg6[%c0_119, %c0_120] : memref<1x384xf32, #tpu.memory_space<vmem>>, vector<1x384xf32>
      %264 = vector.broadcast %263 : vector<1x384xf32> to vector<64x384xf32>
      %265 = arith.addf %262, %264 : vector<64x384xf32>
      %266 = vector.extract_strided_slice %265 {offsets = [0, 0], sizes = [64, 128], strides = [1, 1]} : vector<64x384xf32> to vector<64x128xf32>
      %267 = arith.truncf %266 : vector<64x128xf32> to vector<64x128xbf16>
      %c0_121 = arith.constant 0 : index
      %c0_122 = arith.constant 0 : index
      %268 = vector.load %arg11[%c0_121, %c0_122] : memref<64x128xbf16, #tpu.memory_space<vmem>>, vector<64x128xbf16>
      tpu.vector_store %arg11[%c0_121, %c0_122], %267 {strides = array<i32>} : memref<64x128xbf16, #tpu.memory_space<vmem>>, vector<64x128xbf16>,
      %269 = vector.extract_strided_slice %265 {offsets = [0, 128], sizes = [64, 128], strides = [1, 1]} : vector<64x384xf32> to vector<64x128xf32>
      %270 = arith.truncf %269 : vector<64x128xf32> to vector<64x128xbf16>
      %c0_123 = arith.constant 0 : index
      %c0_124 = arith.constant 0 : index
      %271 = vector.load %arg12[%c0_123, %c0_124] : memref<64x128xbf16, #tpu.memory_space<vmem>>, vector<64x128xbf16>
      tpu.vector_store %arg12[%c0_123, %c0_124], %270 {strides = array<i32>} : memref<64x128xbf16, #tpu.memory_space<vmem>>, vector<64x128xbf16>,
      %272 = vector.extract_strided_slice %265 {offsets = [0, 256], sizes = [64, 128], strides = [1, 1]} : vector<64x384xf32> to vector<64x128xf32>
      %c0_125 = arith.constant 0 : index
      %c0_126 = arith.constant 0 : index
      %c0_127 = arith.constant 0 : index
      %273 = vector.load %arg3[%c0_125, %c0_126, %c0_127] : memref<1x64x1xf32, #tpu.memory_space<vmem>>, vector<1x64x1xf32>
      %274 = vector.shape_cast %273 : vector<1x64x1xf32> to vector<64x1xf32>
      %275 = vector.broadcast %274 : vector<64x1xf32> to vector<64x128xf32>
      %276 = arith.mulf %272, %275 : vector<64x128xf32>
      %277 = arith.truncf %276 : vector<64x128xf32> to vector<64x128xbf16>
      %c0_128 = arith.constant 0 : index
      %c0_129 = arith.constant 0 : index
      %278 = vector.load %arg13[%c0_128, %c0_129] : memref<64x128xbf16, #tpu.memory_space<vmem>>, vector<64x128xbf16>
      tpu.vector_store %arg13[%c0_128, %c0_129], %277 {strides = array<i32>} : memref<64x128xbf16, #tpu.memory_space<vmem>>, vector<64x128xbf16>,
      %cst_130 = arith.constant 0.000000e+00 : f32
      %279 = vector.broadcast %cst_130 : f32 to vector<77x128xf32>
      %c0_131 = arith.constant 0 : index
      %c0_132 = arith.constant 0 : index
      %280 = vector.load %arg14[%c0_131, %c0_132] : memref<77x128xf32, #tpu.memory_space<vmem>>, vector<77x128xf32>
      tpu.vector_store %arg14[%c0_131, %c0_132], %279 {strides = array<i32>} : memref<77x128xf32, #tpu.memory_space<vmem>>, vector<77x128xf32>,
      %c8_133 = arith.constant 8 : index
      %c0_134 = arith.constant 0 : index
      %281 = vector.load %arg14[%c8_133, %c0_134] : memref<77x128xf32, #tpu.memory_space<vmem>>, vector<64x128xf32>
      tpu.vector_store %arg14[%c8_133, %c0_134], %276 {strides = array<i32>} : memref<77x128xf32, #tpu.memory_space<vmem>>, vector<64x128xf32>,
    } else {
    }
    %c32_i32 = arith.constant 32 : i32
    %3 = arith.muli %arg1, %c32_i32 : i32
    %4 = tpu.assume_multiple %3, 32 : i32
    %cst = arith.constant 0.000000e+00 : f32
    %5 = vector.broadcast %cst : f32 to vector<32x128xf32>
    %c0_i32_1 = arith.constant 0 : i32
    %6 = arith.addi %4, %c0_i32_1 : i32
    %c8_i32 = arith.constant 8 : i32
    %7 = arith.addi %6, %c8_i32 : i32
    %c5_i32 = arith.constant 5 : i32
    %8 = arith.subi %7, %c5_i32 : i32
    %9 = arith.index_cast %8 : i32 to index
    %c0 = arith.constant 0 : index
    %10 = vector.load %arg14[%9, %c0] : memref<77x128xf32, #tpu.memory_space<vmem>>, vector<32x128xf32>
    %c0_2 = arith.constant 0 : index
    %c0_3 = arith.constant 0 : index
    %11 = vector.load %arg7[%c0_2, %c0_3] : memref<11x128xf32, #tpu.memory_space<vmem>>, vector<1x128xf32>
    %12 = vector.shape_cast %11 : vector<1x128xf32> to vector<128xf32>
    %13 = vector.shape_cast %12 : vector<128xf32> to vector<1x128xf32>
    %14 = vector.broadcast %13 : vector<1x128xf32> to vector<32x128xf32>
    %15 = arith.mulf %10, %14 : vector<32x128xf32>
    %16 = arith.addf %5, %15 : vector<32x128xf32>
    %c1_i32 = arith.constant 1 : i32
    %17 = arith.addi %4, %c1_i32 : i32
    %c8_i32_4 = arith.constant 8 : i32
    %18 = arith.addi %17, %c8_i32_4 : i32
    %c5_i32_5 = arith.constant 5 : i32
    %19 = arith.subi %18, %c5_i32_5 : i32
    %20 = arith.index_cast %19 : i32 to index
    %c0_6 = arith.constant 0 : index
    %21 = vector.load %arg14[%20, %c0_6] : memref<77x128xf32, #tpu.memory_space<vmem>>, vector<32x128xf32>
    %c1 = arith.constant 1 : index
    %c0_7 = arith.constant 0 : index
    %22 = vector.load %arg7[%c1, %c0_7] : memref<11x128xf32, #tpu.memory_space<vmem>>, vector<1x128xf32>
    %23 = vector.shape_cast %22 : vector<1x128xf32> to vector<128xf32>
    %24 = vector.shape_cast %23 : vector<128xf32> to vector<1x128xf32>
    %25 = vector.broadcast %24 : vector<1x128xf32> to vector<32x128xf32>
    %26 = arith.mulf %21, %25 : vector<32x128xf32>
    %27 = arith.addf %16, %26 : vector<32x128xf32>
    %c2_i32 = arith.constant 2 : i32
    %28 = arith.addi %4, %c2_i32 : i32
    %c8_i32_8 = arith.constant 8 : i32
    %29 = arith.addi %28, %c8_i32_8 : i32
    %c5_i32_9 = arith.constant 5 : i32
    %30 = arith.subi %29, %c5_i32_9 : i32
    %31 = arith.index_cast %30 : i32 to index
    %c0_10 = arith.constant 0 : index
    %32 = vector.load %arg14[%31, %c0_10] : memref<77x128xf32, #tpu.memory_space<vmem>>, vector<32x128xf32>
    %c2 = arith.constant 2 : index
    %c0_11 = arith.constant 0 : index
    %33 = vector.load %arg7[%c2, %c0_11] : memref<11x128xf32, #tpu.memory_space<vmem>>, vector<1x128xf32>
    %34 = vector.shape_cast %33 : vector<1x128xf32> to vector<128xf32>
    %35 = vector.shape_cast %34 : vector<128xf32> to vector<1x128xf32>
    %36 = vector.broadcast %35 : vector<1x128xf32> to vector<32x128xf32>
    %37 = arith.mulf %32, %36 : vector<32x128xf32>
    %38 = arith.addf %27, %37 : vector<32x128xf32>
    %c3_i32 = arith.constant 3 : i32
    %39 = arith.addi %4, %c3_i32 : i32
    %c8_i32_12 = arith.constant 8 : i32
    %40 = arith.addi %39, %c8_i32_12 : i32
    %c5_i32_13 = arith.constant 5 : i32
    %41 = arith.subi %40, %c5_i32_13 : i32
    %42 = arith.index_cast %41 : i32 to index
    %c0_14 = arith.constant 0 : index
    %43 = vector.load %arg14[%42, %c0_14] : memref<77x128xf32, #tpu.memory_space<vmem>>, vector<32x128xf32>
    %c3 = arith.constant 3 : index
    %c0_15 = arith.constant 0 : index
    %44 = vector.load %arg7[%c3, %c0_15] : memref<11x128xf32, #tpu.memory_space<vmem>>, vector<1x128xf32>
    %45 = vector.shape_cast %44 : vector<1x128xf32> to vector<128xf32>
    %46 = vector.shape_cast %45 : vector<128xf32> to vector<1x128xf32>
    %47 = vector.broadcast %46 : vector<1x128xf32> to vector<32x128xf32>
    %48 = arith.mulf %43, %47 : vector<32x128xf32>
    %49 = arith.addf %38, %48 : vector<32x128xf32>
    %c4_i32 = arith.constant 4 : i32
    %50 = arith.addi %4, %c4_i32 : i32
    %c8_i32_16 = arith.constant 8 : i32
    %51 = arith.addi %50, %c8_i32_16 : i32
    %c5_i32_17 = arith.constant 5 : i32
    %52 = arith.subi %51, %c5_i32_17 : i32
    %53 = arith.index_cast %52 : i32 to index
    %c0_18 = arith.constant 0 : index
    %54 = vector.load %arg14[%53, %c0_18] : memref<77x128xf32, #tpu.memory_space<vmem>>, vector<32x128xf32>
    %c4 = arith.constant 4 : index
    %c0_19 = arith.constant 0 : index
    %55 = vector.load %arg7[%c4, %c0_19] : memref<11x128xf32, #tpu.memory_space<vmem>>, vector<1x128xf32>
    %56 = vector.shape_cast %55 : vector<1x128xf32> to vector<128xf32>
    %57 = vector.shape_cast %56 : vector<128xf32> to vector<1x128xf32>
    %58 = vector.broadcast %57 : vector<1x128xf32> to vector<32x128xf32>
    %59 = arith.mulf %54, %58 : vector<32x128xf32>
    %60 = arith.addf %49, %59 : vector<32x128xf32>
    %c5_i32_20 = arith.constant 5 : i32
    %61 = arith.addi %4, %c5_i32_20 : i32
    %c8_i32_21 = arith.constant 8 : i32
    %62 = arith.addi %61, %c8_i32_21 : i32
    %c5_i32_22 = arith.constant 5 : i32
    %63 = arith.subi %62, %c5_i32_22 : i32
    %64 = arith.index_cast %63 : i32 to index
    %c0_23 = arith.constant 0 : index
    %65 = vector.load %arg14[%64, %c0_23] : memref<77x128xf32, #tpu.memory_space<vmem>>, vector<32x128xf32>
    %c5 = arith.constant 5 : index
    %c0_24 = arith.constant 0 : index
    %66 = vector.load %arg7[%c5, %c0_24] : memref<11x128xf32, #tpu.memory_space<vmem>>, vector<1x128xf32>
    %67 = vector.shape_cast %66 : vector<1x128xf32> to vector<128xf32>
    %68 = vector.shape_cast %67 : vector<128xf32> to vector<1x128xf32>
    %69 = vector.broadcast %68 : vector<1x128xf32> to vector<32x128xf32>
    %70 = arith.mulf %65, %69 : vector<32x128xf32>
    %71 = arith.addf %60, %70 : vector<32x128xf32>
    %c6_i32 = arith.constant 6 : i32
    %72 = arith.addi %4, %c6_i32 : i32
    %c8_i32_25 = arith.constant 8 : i32
    %73 = arith.addi %72, %c8_i32_25 : i32
    %c5_i32_26 = arith.constant 5 : i32
    %74 = arith.subi %73, %c5_i32_26 : i32
    %75 = arith.index_cast %74 : i32 to index
    %c0_27 = arith.constant 0 : index
    %76 = vector.load %arg14[%75, %c0_27] : memref<77x128xf32, #tpu.memory_space<vmem>>, vector<32x128xf32>
    %c6 = arith.constant 6 : index
    %c0_28 = arith.constant 0 : index
    %77 = vector.load %arg7[%c6, %c0_28] : memref<11x128xf32, #tpu.memory_space<vmem>>, vector<1x128xf32>
    %78 = vector.shape_cast %77 : vector<1x128xf32> to vector<128xf32>
    %79 = vector.shape_cast %78 : vector<128xf32> to vector<1x128xf32>
    %80 = vector.broadcast %79 : vector<1x128xf32> to vector<32x128xf32>
    %81 = arith.mulf %76, %80 : vector<32x128xf32>
    %82 = arith.addf %71, %81 : vector<32x128xf32>
    %c7_i32 = arith.constant 7 : i32
    %83 = arith.addi %4, %c7_i32 : i32
    %c8_i32_29 = arith.constant 8 : i32
    %84 = arith.addi %83, %c8_i32_29 : i32
    %c5_i32_30 = arith.constant 5 : i32
    %85 = arith.subi %84, %c5_i32_30 : i32
    %86 = arith.index_cast %85 : i32 to index
    %c0_31 = arith.constant 0 : index
    %87 = vector.load %arg14[%86, %c0_31] : memref<77x128xf32, #tpu.memory_space<vmem>>, vector<32x128xf32>
    %c7 = arith.constant 7 : index
    %c0_32 = arith.constant 0 : index
    %88 = vector.load %arg7[%c7, %c0_32] : memref<11x128xf32, #tpu.memory_space<vmem>>, vector<1x128xf32>
    %89 = vector.shape_cast %88 : vector<1x128xf32> to vector<128xf32>
    %90 = vector.shape_cast %89 : vector<128xf32> to vector<1x128xf32>
    %91 = vector.broadcast %90 : vector<1x128xf32> to vector<32x128xf32>
    %92 = arith.mulf %87, %91 : vector<32x128xf32>
    %93 = arith.addf %82, %92 : vector<32x128xf32>
    %c8_i32_33 = arith.constant 8 : i32
    %94 = arith.addi %4, %c8_i32_33 : i32
    %c8_i32_34 = arith.constant 8 : i32
    %95 = arith.addi %94, %c8_i32_34 : i32
    %c5_i32_35 = arith.constant 5 : i32
    %96 = arith.subi %95, %c5_i32_35 : i32
    %97 = arith.index_cast %96 : i32 to index
    %c0_36 = arith.constant 0 : index
    %98 = vector.load %arg14[%97, %c0_36] : memref<77x128xf32, #tpu.memory_space<vmem>>, vector<32x128xf32>
    %c8 = arith.constant 8 : index
    %c0_37 = arith.constant 0 : index
    %99 = vector.load %arg7[%c8, %c0_37] : memref<11x128xf32, #tpu.memory_space<vmem>>, vector<1x128xf32>
    %100 = vector.shape_cast %99 : vector<1x128xf32> to vector<128xf32>
    %101 = vector.shape_cast %100 : vector<128xf32> to vector<1x128xf32>
    %102 = vector.broadcast %101 : vector<1x128xf32> to vector<32x128xf32>
    %103 = arith.mulf %98, %102 : vector<32x128xf32>
    %104 = arith.addf %93, %103 : vector<32x128xf32>
    %c9_i32 = arith.constant 9 : i32
    %105 = arith.addi %4, %c9_i32 : i32
    %c8_i32_38 = arith.constant 8 : i32
    %106 = arith.addi %105, %c8_i32_38 : i32
    %c5_i32_39 = arith.constant 5 : i32
    %107 = arith.subi %106, %c5_i32_39 : i32
    %108 = arith.index_cast %107 : i32 to index
    %c0_40 = arith.constant 0 : index
    %109 = vector.load %arg14[%108, %c0_40] : memref<77x128xf32, #tpu.memory_space<vmem>>, vector<32x128xf32>
    %c9 = arith.constant 9 : index
    %c0_41 = arith.constant 0 : index
    %110 = vector.load %arg7[%c9, %c0_41] : memref<11x128xf32, #tpu.memory_space<vmem>>, vector<1x128xf32>
    %111 = vector.shape_cast %110 : vector<1x128xf32> to vector<128xf32>
    %112 = vector.shape_cast %111 : vector<128xf32> to vector<1x128xf32>
    %113 = vector.broadcast %112 : vector<1x128xf32> to vector<32x128xf32>
    %114 = arith.mulf %109, %113 : vector<32x128xf32>
    %115 = arith.addf %104, %114 : vector<32x128xf32>
    %c10_i32 = arith.constant 10 : i32
    %116 = arith.addi %4, %c10_i32 : i32
    %c8_i32_42 = arith.constant 8 : i32
    %117 = arith.addi %116, %c8_i32_42 : i32
    %c5_i32_43 = arith.constant 5 : i32
    %118 = arith.subi %117, %c5_i32_43 : i32
    %119 = arith.index_cast %118 : i32 to index
    %c0_44 = arith.constant 0 : index
    %120 = vector.load %arg14[%119, %c0_44] : memref<77x128xf32, #tpu.memory_space<vmem>>, vector<32x128xf32>
    %c10 = arith.constant 10 : index
    %c0_45 = arith.constant 0 : index
    %121 = vector.load %arg7[%c10, %c0_45] : memref<11x128xf32, #tpu.memory_space<vmem>>, vector<1x128xf32>
    %122 = vector.shape_cast %121 : vector<1x128xf32> to vector<128xf32>
    %123 = vector.shape_cast %122 : vector<128xf32> to vector<1x128xf32>
    %124 = vector.broadcast %123 : vector<1x128xf32> to vector<32x128xf32>
    %125 = arith.mulf %120, %124 : vector<32x128xf32>
    %126 = arith.addf %115, %125 : vector<32x128xf32>
    %c8_i32_46 = arith.constant 8 : i32
    %127 = arith.addi %4, %c8_i32_46 : i32
    %128 = arith.index_cast %127 : i32 to index
    %c0_47 = arith.constant 0 : index
    %129 = vector.load %arg14[%128, %c0_47] : memref<77x128xf32, #tpu.memory_space<vmem>>, vector<32x128xf32>
    %c0_48 = arith.constant 0 : index
    %130 = arith.index_cast %4 : i32 to index
    %c0_49 = arith.constant 0 : index
    %131 = vector.load %arg3[%c0_48, %130, %c0_49] : memref<1x64x1xf32, #tpu.memory_space<vmem>>, vector<1x32x1xf32>
    %132 = vector.shape_cast %131 : vector<1x32x1xf32> to vector<32x1xf32>
    %133 = arith.addf %126, %129 : vector<32x128xf32>
    %134 = vector.broadcast %132 : vector<32x1xf32> to vector<32x128xf32>
    %135 = arith.mulf %133, %134 : vector<32x128xf32>
    %c0_50 = arith.constant 0 : index
    %c0_51 = arith.constant 0 : index
    %c0_52 = arith.constant 0 : index
    %136 = vector.load %arg4[%c0_50, %c0_51, %c0_52] : memref<1x1x64xf32, #tpu.memory_space<vmem>>, vector<1x1x64xf32>
    %137 = vector.shape_cast %136 : vector<1x1x64xf32> to vector<1x64xf32>
    %cst_53 = arith.constant 0.000000e+00 : f32
    %138 = vector.broadcast %cst_53 : f32 to vector<1x64xf32>
    %139 = arith.cmpf oeq, %137, %138 : vector<1x64xf32>
    %140 = arith.index_cast %4 : i32 to index
    %c0_54 = arith.constant 0 : index
    %141 = vector.load %arg11[%140, %c0_54] : memref<64x128xbf16, #tpu.memory_space<vmem>>, vector<32x32xbf16>
    %c0_55 = arith.constant 0 : index
    %c0_56 = arith.constant 0 : index
    %142 = vector.load %arg12[%c0_55, %c0_56] : memref<64x128xbf16, #tpu.memory_space<vmem>>, vector<64x32xbf16>
    %c0_57 = arith.constant 0 : index
    %c0_58 = arith.constant 0 : index
    %143 = vector.load %arg13[%c0_57, %c0_58] : memref<64x128xbf16, #tpu.memory_space<vmem>>, vector<64x32xbf16>
    "tpu.trace_start"() <{level = 10 : i32, message = "qd,kd->qk"}> : () -> ()
    %cst_59 = arith.constant dense<0.000000e+00> : vector<32x64xf32>
    %144 = tpu.matmul %141, %142, %cst_59 {dimension_numbers = #tpu.dot_dimension_numbers<[1], [1], [0], [0], [0, 0, 1, 0], [], []>} : vector<32x32xbf16>, vector<64x32xbf16>, vector<32x64xf32> -> vector<32x64xf32>
    %cst_60 = arith.constant -1.000000e+30 : f32
    "tpu.trace_stop"() : () -> ()
    %145 = vector.shape_cast %139 : vector<1x64xi1> to vector<1x64xi1>
    %146 = vector.broadcast %145 : vector<1x64xi1> to vector<32x64xi1>
    %147 = vector.broadcast %cst_60 : f32 to vector<32x64xf32>
    %148 = arith.select %146, %147, %144 : vector<32x64xi1>, vector<32x64xf32>
    %cst_61 = arith.constant dense<0xFF800000> : vector<32xf32>
    %149 = vector.multi_reduction <maximumf>, %148, %cst_61 [1] : vector<32x64xf32> to vector<32xf32>
    %150 = vector.shape_cast %149 : vector<32xf32> to vector<32x1xf32>
    %151 = vector.broadcast %150 : vector<32x1xf32> to vector<32x64xf32>
    %152 = arith.subf %148, %151 : vector<32x64xf32>
    %153 = math.exp %152 : vector<32x64xf32>
    %cst_62 = arith.constant dense<0.000000e+00> : vector<32xf32>
    %154 = vector.multi_reduction <add>, %153, %cst_62 [1] : vector<32x64xf32> to vector<32xf32>
    %155 = vector.shape_cast %154 : vector<32xf32> to vector<32x1xf32>
    %156 = tpu.reciprocal %155 {approx = true} : vector<32x1xf32> -> vector<32x1xf32>
    %157 = vector.broadcast %156 : vector<32x1xf32> to vector<32x64xf32>
    %158 = arith.mulf %153, %157 : vector<32x64xf32>
    %cst_63 = arith.constant 0.000000e+00 : f32
    %159 = vector.shape_cast %139 : vector<1x64xi1> to vector<1x64xi1>
    %160 = vector.broadcast %159 : vector<1x64xi1> to vector<32x64xi1>
    %161 = vector.broadcast %cst_63 : f32 to vector<32x64xf32>
    %162 = arith.select %160, %161, %158 : vector<32x64xi1>, vector<32x64xf32>
    %163 = arith.truncf %162 : vector<32x64xf32> to vector<32x64xbf16>
    %cst_64 = arith.constant dense<0.000000e+00> : vector<32x32xf32>
    %164 = tpu.matmul %163, %143, %cst_64 {dimension_numbers = #tpu.dot_dimension_numbers<[1], [0], [0], [1], [0, 0, 1, 1], [], []>} : vector<32x64xbf16>, vector<64x32xbf16>, vector<32x32xf32> -> vector<32x32xf32>
    %165 = arith.truncf %164 : vector<32x32xf32> to vector<32x32xbf16>
    %c0_65 = arith.constant 0 : index
    %c0_66 = arith.constant 0 : index
    %166 = vector.load %arg15[%c0_65, %c0_66] : memref<32x128xbf16, #tpu.memory_space<vmem>>, vector<32x32xbf16>
    tpu.vector_store %arg15[%c0_65, %c0_66], %165 {strides = array<i32>} : memref<32x128xbf16, #tpu.memory_space<vmem>>, vector<32x32xbf16>,
    %167 = arith.index_cast %4 : i32 to index
    %c32 = arith.constant 32 : index
    %168 = vector.load %arg11[%167, %c32] : memref<64x128xbf16, #tpu.memory_space<vmem>>, vector<32x32xbf16>
    %c0_67 = arith.constant 0 : index
    %c32_68 = arith.constant 32 : index
    %169 = vector.load %arg12[%c0_67, %c32_68] : memref<64x128xbf16, #tpu.memory_space<vmem>>, vector<64x32xbf16>
    %c0_69 = arith.constant 0 : index
    %c32_70 = arith.constant 32 : index
    %170 = vector.load %arg13[%c0_69, %c32_70] : memref<64x128xbf16, #tpu.memory_space<vmem>>, vector<64x32xbf16>
    "tpu.trace_start"() <{level = 10 : i32, message = "qd,kd->qk"}> : () -> ()
    %cst_71 = arith.constant dense<0.000000e+00> : vector<32x64xf32>
    %171 = tpu.matmul %168, %169, %cst_71 {dimension_numbers = #tpu.dot_dimension_numbers<[1], [1], [0], [0], [0, 0, 1, 0], [], []>} : vector<32x32xbf16>, vector<64x32xbf16>, vector<32x64xf32> -> vector<32x64xf32>
    %cst_72 = arith.constant -1.000000e+30 : f32
    "tpu.trace_stop"() : () -> ()
    %172 = vector.shape_cast %139 : vector<1x64xi1> to vector<1x64xi1>
    %173 = vector.broadcast %172 : vector<1x64xi1> to vector<32x64xi1>
    %174 = vector.broadcast %cst_72 : f32 to vector<32x64xf32>
    %175 = arith.select %173, %174, %171 : vector<32x64xi1>, vector<32x64xf32>
    %cst_73 = arith.constant dense<0xFF800000> : vector<32xf32>
    %176 = vector.multi_reduction <maximumf>, %175, %cst_73 [1] : vector<32x64xf32> to vector<32xf32>
    %177 = vector.shape_cast %176 : vector<32xf32> to vector<32x1xf32>
    %178 = vector.broadcast %177 : vector<32x1xf32> to vector<32x64xf32>
    %179 = arith.subf %175, %178 : vector<32x64xf32>
    %180 = math.exp %179 : vector<32x64xf32>
    %cst_74 = arith.constant dense<0.000000e+00> : vector<32xf32>
    %181 = vector.multi_reduction <add>, %180, %cst_74 [1] : vector<32x64xf32> to vector<32xf32>
    %182 = vector.shape_cast %181 : vector<32xf32> to vector<32x1xf32>
    %183 = tpu.reciprocal %182 {approx = true} : vector<32x1xf32> -> vector<32x1xf32>
    %184 = vector.broadcast %183 : vector<32x1xf32> to vector<32x64xf32>
    %185 = arith.mulf %180, %184 : vector<32x64xf32>
    %cst_75 = arith.constant 0.000000e+00 : f32
    %186 = vector.shape_cast %139 : vector<1x64xi1> to vector<1x64xi1>
    %187 = vector.broadcast %186 : vector<1x64xi1> to vector<32x64xi1>
    %188 = vector.broadcast %cst_75 : f32 to vector<32x64xf32>
    %189 = arith.select %187, %188, %185 : vector<32x64xi1>, vector<32x64xf32>
    %190 = arith.truncf %189 : vector<32x64xf32> to vector<32x64xbf16>
    %cst_76 = arith.constant dense<0.000000e+00> : vector<32x32xf32>
    %191 = tpu.matmul %190, %170, %cst_76 {dimension_numbers = #tpu.dot_dimension_numbers<[1], [0], [0], [1], [0, 0, 1, 1], [], []>} : vector<32x64xbf16>, vector<64x32xbf16>, vector<32x32xf32> -> vector<32x32xf32>
    %192 = arith.truncf %191 : vector<32x32xf32> to vector<32x32xbf16>
    %c0_77 = arith.constant 0 : index
    %c32_78 = arith.constant 32 : index
    %193 = vector.load %arg15[%c0_77, %c32_78] : memref<32x128xbf16, #tpu.memory_space<vmem>>, vector<32x32xbf16>
    tpu.vector_store %arg15[%c0_77, %c32_78], %192 {strides = array<i32>} : memref<32x128xbf16, #tpu.memory_space<vmem>>, vector<32x32xbf16>,
    %194 = arith.index_cast %4 : i32 to index
    %c64 = arith.constant 64 : index
    %195 = vector.load %arg11[%194, %c64] : memref<64x128xbf16, #tpu.memory_space<vmem>>, vector<32x32xbf16>
    %c0_79 = arith.constant 0 : index
    %c64_80 = arith.constant 64 : index
    %196 = vector.load %arg12[%c0_79, %c64_80] : memref<64x128xbf16, #tpu.memory_space<vmem>>, vector<64x32xbf16>
    %c0_81 = arith.constant 0 : index
    %c64_82 = arith.constant 64 : index
    %197 = vector.load %arg13[%c0_81, %c64_82] : memref<64x128xbf16, #tpu.memory_space<vmem>>, vector<64x32xbf16>
    "tpu.trace_start"() <{level = 10 : i32, message = "qd,kd->qk"}> : () -> ()
    %cst_83 = arith.constant dense<0.000000e+00> : vector<32x64xf32>
    %198 = tpu.matmul %195, %196, %cst_83 {dimension_numbers = #tpu.dot_dimension_numbers<[1], [1], [0], [0], [0, 0, 1, 0], [], []>} : vector<32x32xbf16>, vector<64x32xbf16>, vector<32x64xf32> -> vector<32x64xf32>
    %cst_84 = arith.constant -1.000000e+30 : f32
    "tpu.trace_stop"() : () -> ()
    %199 = vector.shape_cast %139 : vector<1x64xi1> to vector<1x64xi1>
    %200 = vector.broadcast %199 : vector<1x64xi1> to vector<32x64xi1>
    %201 = vector.broadcast %cst_84 : f32 to vector<32x64xf32>
    %202 = arith.select %200, %201, %198 : vector<32x64xi1>, vector<32x64xf32>
    %cst_85 = arith.constant dense<0xFF800000> : vector<32xf32>
    %203 = vector.multi_reduction <maximumf>, %202, %cst_85 [1] : vector<32x64xf32> to vector<32xf32>
    %204 = vector.shape_cast %203 : vector<32xf32> to vector<32x1xf32>
    %205 = vector.broadcast %204 : vector<32x1xf32> to vector<32x64xf32>
    %206 = arith.subf %202, %205 : vector<32x64xf32>
    %207 = math.exp %206 : vector<32x64xf32>
    %cst_86 = arith.constant dense<0.000000e+00> : vector<32xf32>
    %208 = vector.multi_reduction <add>, %207, %cst_86 [1] : vector<32x64xf32> to vector<32xf32>
    %209 = vector.shape_cast %208 : vector<32xf32> to vector<32x1xf32>
    %210 = tpu.reciprocal %209 {approx = true} : vector<32x1xf32> -> vector<32x1xf32>
    %211 = vector.broadcast %210 : vector<32x1xf32> to vector<32x64xf32>
    %212 = arith.mulf %207, %211 : vector<32x64xf32>
    %cst_87 = arith.constant 0.000000e+00 : f32
    %213 = vector.shape_cast %139 : vector<1x64xi1> to vector<1x64xi1>
    %214 = vector.broadcast %213 : vector<1x64xi1> to vector<32x64xi1>
    %215 = vector.broadcast %cst_87 : f32 to vector<32x64xf32>
    %216 = arith.select %214, %215, %212 : vector<32x64xi1>, vector<32x64xf32>
    %217 = arith.truncf %216 : vector<32x64xf32> to vector<32x64xbf16>
    %cst_88 = arith.constant dense<0.000000e+00> : vector<32x32xf32>
    %218 = tpu.matmul %217, %197, %cst_88 {dimension_numbers = #tpu.dot_dimension_numbers<[1], [0], [0], [1], [0, 0, 1, 1], [], []>} : vector<32x64xbf16>, vector<64x32xbf16>, vector<32x32xf32> -> vector<32x32xf32>
    %219 = arith.truncf %218 : vector<32x32xf32> to vector<32x32xbf16>
    %c0_89 = arith.constant 0 : index
    %c64_90 = arith.constant 64 : index
    %220 = vector.load %arg15[%c0_89, %c64_90] : memref<32x128xbf16, #tpu.memory_space<vmem>>, vector<32x32xbf16>
    tpu.vector_store %arg15[%c0_89, %c64_90], %219 {strides = array<i32>} : memref<32x128xbf16, #tpu.memory_space<vmem>>, vector<32x32xbf16>,
    %221 = arith.index_cast %4 : i32 to index
    %c96 = arith.constant 96 : index
    %222 = vector.load %arg11[%221, %c96] : memref<64x128xbf16, #tpu.memory_space<vmem>>, vector<32x32xbf16>
    %c0_91 = arith.constant 0 : index
    %c96_92 = arith.constant 96 : index
    %223 = vector.load %arg12[%c0_91, %c96_92] : memref<64x128xbf16, #tpu.memory_space<vmem>>, vector<64x32xbf16>
    %c0_93 = arith.constant 0 : index
    %c96_94 = arith.constant 96 : index
    %224 = vector.load %arg13[%c0_93, %c96_94] : memref<64x128xbf16, #tpu.memory_space<vmem>>, vector<64x32xbf16>
    "tpu.trace_start"() <{level = 10 : i32, message = "qd,kd->qk"}> : () -> ()
    %cst_95 = arith.constant dense<0.000000e+00> : vector<32x64xf32>
    %225 = tpu.matmul %222, %223, %cst_95 {dimension_numbers = #tpu.dot_dimension_numbers<[1], [1], [0], [0], [0, 0, 1, 0], [], []>} : vector<32x32xbf16>, vector<64x32xbf16>, vector<32x64xf32> -> vector<32x64xf32>
    %cst_96 = arith.constant -1.000000e+30 : f32
    "tpu.trace_stop"() : () -> ()
    %226 = vector.shape_cast %139 : vector<1x64xi1> to vector<1x64xi1>
    %227 = vector.broadcast %226 : vector<1x64xi1> to vector<32x64xi1>
    %228 = vector.broadcast %cst_96 : f32 to vector<32x64xf32>
    %229 = arith.select %227, %228, %225 : vector<32x64xi1>, vector<32x64xf32>
    %cst_97 = arith.constant dense<0xFF800000> : vector<32xf32>
    %230 = vector.multi_reduction <maximumf>, %229, %cst_97 [1] : vector<32x64xf32> to vector<32xf32>
    %231 = vector.shape_cast %230 : vector<32xf32> to vector<32x1xf32>
    %232 = vector.broadcast %231 : vector<32x1xf32> to vector<32x64xf32>
    %233 = arith.subf %229, %232 : vector<32x64xf32>
    %234 = math.exp %233 : vector<32x64xf32>
    %cst_98 = arith.constant dense<0.000000e+00> : vector<32xf32>
    %235 = vector.multi_reduction <add>, %234, %cst_98 [1] : vector<32x64xf32> to vector<32xf32>
    %236 = vector.shape_cast %235 : vector<32xf32> to vector<32x1xf32>
    %237 = tpu.reciprocal %236 {approx = true} : vector<32x1xf32> -> vector<32x1xf32>
    %238 = vector.broadcast %237 : vector<32x1xf32> to vector<32x64xf32>
    %239 = arith.mulf %234, %238 : vector<32x64xf32>
    %cst_99 = arith.constant 0.000000e+00 : f32
    %240 = vector.shape_cast %139 : vector<1x64xi1> to vector<1x64xi1>
    %241 = vector.broadcast %240 : vector<1x64xi1> to vector<32x64xi1>
    %242 = vector.broadcast %cst_99 : f32 to vector<32x64xf32>
    %243 = arith.select %241, %242, %239 : vector<32x64xi1>, vector<32x64xf32>
    %244 = arith.truncf %243 : vector<32x64xf32> to vector<32x64xbf16>
    %cst_100 = arith.constant dense<0.000000e+00> : vector<32x32xf32>
    %245 = tpu.matmul %244, %224, %cst_100 {dimension_numbers = #tpu.dot_dimension_numbers<[1], [0], [0], [1], [0, 0, 1, 1], [], []>} : vector<32x64xbf16>, vector<64x32xbf16>, vector<32x32xf32> -> vector<32x32xf32>
    %246 = arith.truncf %245 : vector<32x32xf32> to vector<32x32xbf16>
    %c0_101 = arith.constant 0 : index
    %c96_102 = arith.constant 96 : index
    %247 = vector.load %arg15[%c0_101, %c96_102] : memref<32x128xbf16, #tpu.memory_space<vmem>>, vector<32x32xbf16>
    tpu.vector_store %arg15[%c0_101, %c96_102], %246 {strides = array<i32>} : memref<32x128xbf16, #tpu.memory_space<vmem>>, vector<32x32xbf16>,
    %c0_103 = arith.constant 0 : index
    %c0_104 = arith.constant 0 : index
    %248 = vector.load %arg15[%c0_103, %c0_104] : memref<32x128xbf16, #tpu.memory_space<vmem>>, vector<32x128xbf16>
    %c0_105 = arith.constant 0 : index
    %c0_106 = arith.constant 0 : index
    %249 = vector.load %arg8[%c0_105, %c0_106] : memref<128x128xbf16, #tpu.memory_space<vmem>>, vector<128x128xbf16>
    %cst_107 = arith.constant dense<0.000000e+00> : vector<32x128xf32>
    %250 = tpu.matmul %248, %249, %cst_107 {dimension_numbers = #tpu.dot_dimension_numbers<[1], [0], [0], [1], [0, 0, 1, 1], [], []>} : vector<32x128xbf16>, vector<128x128xbf16>, vector<32x128xf32> -> vector<32x128xf32>
    %c0_108 = arith.constant 0 : index
    %c0_109 = arith.constant 0 : index
    %251 = vector.load %arg9[%c0_108, %c0_109] : memref<1x128xf32, #tpu.memory_space<vmem>>, vector<1x128xf32>
    %252 = vector.broadcast %251 : vector<1x128xf32> to vector<32x128xf32>
    %253 = arith.addf %250, %252 : vector<32x128xf32>
    %254 = arith.addf %253, %135 : vector<32x128xf32>
    %c0_110 = arith.constant 0 : index
    %c0_111 = arith.constant 0 : index
    %c0_112 = arith.constant 0 : index
    %255 = vector.load %arg10[%c0_110, %c0_111, %c0_112] : memref<1x32x128xf32, #tpu.memory_space<vmem>>, vector<1x32x128xf32>
    %256 = vector.shape_cast %255 : vector<1x32x128xf32> to vector<32x128xf32>
    %257 = vector.shape_cast %254 : vector<32x128xf32> to vector<1x32x128xf32>
    tpu.vector_store %arg10[%c0_110, %c0_111, %c0_112], %257 {strides = array<i32>} : memref<1x32x128xf32, #tpu.memory_space<vmem>>, vector<1x32x128xf32>,
    return
  }
  func.func @transform_0(%arg0: i32, %arg1: i32) -> (i32, i32, i32) {
    %c0_i32 = arith.constant 0 : i32
    %c0_i32_0 = arith.constant 0 : i32
    %c0_i32_1 = arith.constant 0 : i32
    return %arg0, %c0_i32, %c0_i32_0 : i32, i32, i32
  }
  func.func @transform_1(%arg0: i32, %arg1: i32) -> (i32, i32, i32) {
    %c0_i32 = arith.constant 0 : i32
    %c0_i32_0 = arith.constant 0 : i32
    %c0_i32_1 = arith.constant 0 : i32
    return %arg0, %c0_i32, %c0_i32_0 : i32, i32, i32
  }
  func.func @transform_2(%arg0: i32, %arg1: i32) -> (i32, i32, i32) {
    %c0_i32 = arith.constant 0 : i32
    %c0_i32_0 = arith.constant 0 : i32
    %c0_i32_1 = arith.constant 0 : i32
    return %arg0, %c0_i32, %c0_i32_0 : i32, i32, i32
  }
  func.func @transform_3(%arg0: i32, %arg1: i32) -> (i32, i32) {
    %c0_i32 = arith.constant 0 : i32
    %c0_i32_0 = arith.constant 0 : i32
    %c0_i32_1 = arith.constant 0 : i32
    return %c0_i32, %c0_i32_0 : i32, i32
  }
  func.func @transform_4(%arg0: i32, %arg1: i32) -> (i32, i32) {
    %c0_i32 = arith.constant 0 : i32
    %c0_i32_0 = arith.constant 0 : i32
    %c0_i32_1 = arith.constant 0 : i32
    return %c0_i32, %c0_i32_0 : i32, i32
  }
  func.func @transform_5(%arg0: i32, %arg1: i32) -> (i32, i32) {
    %c0_i32 = arith.constant 0 : i32
    %c0_i32_0 = arith.constant 0 : i32
    %c0_i32_1 = arith.constant 0 : i32
    return %c0_i32, %c0_i32_0 : i32, i32
  }
  func.func @transform_6(%arg0: i32, %arg1: i32) -> (i32, i32) {
    %c0_i32 = arith.constant 0 : i32
    %c0_i32_0 = arith.constant 0 : i32
    %c0_i32_1 = arith.constant 0 : i32
    return %c0_i32, %c0_i32_0 : i32, i32
  }
  func.func @transform_7(%arg0: i32, %arg1: i32) -> (i32, i32) {
    %c0_i32 = arith.constant 0 : i32
    %c0_i32_0 = arith.constant 0 : i32
    %c0_i32_1 = arith.constant 0 : i32
    return %c0_i32, %c0_i32_0 : i32, i32
  }
  func.func @transform_8(%arg0: i32, %arg1: i32) -> (i32, i32, i32) {
    %c0_i32 = arith.constant 0 : i32
    %c0_i32_0 = arith.constant 0 : i32
    return %arg0, %arg1, %c0_i32 : i32, i32, i32
  }
}

</mosaic_0001>

<bundles_post_ra>
// kernel: tpu_custom_call.1
= control target key start
LH: loop header
LB: loop body
LE: loop exit
PB: predicated region body
PF: predicated region fallthrough
CT: control target
= control target key end

     0   :  { %s3949_s0 = inlined_call_operand.vmem [shape: f32[2,64,64], index: 0, kind: input, shape index: {}]   ;;  %s3950_s1 = inlined_call_operand.vmem [shape: f32[2,64,1], index: 1, kind: input, shape index: {}]   ;;  %s3951_s2 = inlined_call_operand.hbm [shape: f32[2,1,64], index: 2, kind: input, shape index: {}]   ;;  %s3952_s3 = inlined_call_operand.hbm [shape: bf16[64,384], index: 3, kind: input, shape index: {}]   ;;  %s3953_s4 = inlined_call_operand.hbm [shape: f32[1,384], index: 4, kind: input, shape index: {}]   ;;  %s3954_s5 = inlined_call_operand.vmem [shape: f32[11,128], index: 5, kind: input, shape index: {}]   ;;  %s3955_s6 = inlined_call_operand.hbm [shape: bf16[128,128], index: 6, kind: input, shape index: {}]   ;;  %s3956_s7 = inlined_call_operand.vmem [shape: f32[1,128], index: 7, kind: input, shape index: {}]   ;;  %s3957_s8 = inlined_call_operand.hbm [shape: f32[2,64,128], index: 8, kind: output, shape index: {}]  }
   0x1   :  { %3970 = sst [smem:[#allocation24_spill]] %s3950_s1 }
   0x2   :  { %3971 = sst [smem:[#allocation25_spill]] %s3952_s3 }
   0x3   :  { %3972 = sst [smem:[#allocation26_spill]] %s3953_s4 }
   0x4   :  { %3973 = sst [smem:[#allocation27_spill]] %s3954_s5 }
   0x5   :  { %3974 = sst [smem:[#allocation28_spill]] %s3956_s7 }
   0x6   :  { %3975 = sst [smem:[#allocation29_spill]] %s3957_s8 }
   0x7   :  { %13 = vsyncpa [#allocation8], 0 }
   0x8   :  { %15 = vsyncpa [#allocation8 + $0x1], 0 }
   0x9   :  { %16 = vsyncpa [#allocation11], 0 }
   0xa   :  { %17 = vsyncpa [#allocation14], 0 }
   0xb   :  { %18 = vsyncpa [#allocation9], 0 }
   0xc   :  { %20 = vsyncpa [#allocation9 + $0x1], 0  ;;  %s3142_s27 = smov 0   ;;  %s3144_s28 = smov 0  }
   0xd   :  { %s3146_s29 = smov 0   ;;  %s3148_s30 = smov 0  }
   0xe   :  { %s3150_s9 = smov 0   ;;  %s3152_s10 = smov 0  }
   0xf   :  { %s3154_s11 = smov 0   ;;  %s3156_s12 = smov 0  }
  0x10   :  { %s3158_s13 = smov 0   ;;  %s3160_s14 = smov 0  }
  0x11   :  { %s3162_s15 = smov 0  }
  0x12 LB: > { %3976 = sst [smem:[#allocation20_spill]] %s3038_s27  ;;  %s2244_s16 = sadd.s32 4294967295, %s3078_s15   ;;  %s3078_s15 = sphi %s3162_s15, %s26_s15   ;;  %s3074_s14 = sphi %s3160_s14, %s4017_s14   ;;  %s3070_s13 = sphi %s3158_s13, %s4016_s13   ;;  %s3066_s12 = sphi %s3156_s12, %s4015_s12   ;;  %s3062_s11 = sphi %s3154_s11, %s4014_s11   ;;  %s3058_s10 = sphi %s3152_s10, %s4013_s10   ;;  %s3054_s9 = sphi %s3150_s9, %s4012_s9   ;;  %s3050_s30 = sphi %s3148_s30, %s4011_s30   ;;  %s3046_s29 = sphi %s3146_s29, %s4010_s29   ;;  %s3042_s28 = sphi %s3144_s28, %s4009_s28   ;;  %s3038_s27 = sphi %s3142_s27, %s4008_s27  }
  0x13   : > { %3977 = sst [smem:[#allocation21_spill]] %s3062_s11  ;;  %s2245_s17 = sadd.s32 4294967294, %s3078_s15  }
  0x14   : > { %p110_p0 = scmp.ne.s32.totalorder %s3054_s9, %s3050_s30  ;;  %p3198_p1 = scmp.eq.s32.totalorder %s2244_s16, 0 }
  0x15   : > { %p240_p2 = scmp.ne.s32.totalorder %s3046_s29, %s3042_s28  ;;  %p241_p3 = scmp.eq.s32.totalorder %s2244_s16, 3 }
  0x16   : > { %s3978_s18 = scalar_select %p3198_p1, 1, 0 }
  0x17   : > { %p3206_p4 = por %p3198_p1, %p110_p0  ;;  %p246_p5 = scmp.ne.s32.totalorder %s3042_s28, %s3038_s27 }
  0x18   : > { %p3212_p6 = por %p241_p3, %p240_p2  ;;  %p247_p7 = scmp.eq.s32.totalorder %s2245_s17, 3 }
  0x19   : > { %s3979_s19 = scalar_select %p3206_p4, 1, 0 }
  0x1a   : > { %s3980_s20 = scalar_select %p3212_p6, 1, 0 }
  0x1b   : > { %p2246_p8 = scmp.ge.s32.totalorder %s3078_s15, 1  ;;  %p254_p9 = scmp.lt.s32.totalorder %s3078_s15, 5 }
  0x1c   : > { %3981 = sst [smem:[#allocation22_spill]] %s3980_s20  ;;  %p3218_p10 = por %p247_p7, %p246_p5 }
  0x1d   : > { %p3222_p11 = pnand %p2246_p8, %p254_p9  ;;  %s3080_s23 = smov [#allocation10]  }
  0x1e   : > { %s3982_s21 = scalar_select %p3218_p10, 1, 0 }
  0x1f   : > { %s3984_s22 = scalar_select %p3222_p11, 1, 0 }
  0x20   : > { %3983 = sst [smem:[#allocation23_spill]] %s3982_s21  ;;  %s266_s24 = sshll.u32 %s3080_s23, 4  ;;  %s267_s24 = int_to_ptr.vmem [resolvable:$true] %s266_s24 }
  0x21   : > { %p2613_p12 = pneg %p3222_p11  ;;  %s3081_s26 = smov [#allocation12]  }
  0x22   : > { %s280_s30 = sshll.u32 %s3081_s26, 4  ;;  %s3986_s3 = sld [smem:[#allocation25_spill]]  ;;  %s3234_s30 = int_to_ptr.vmem [resolvable:$true] %s280_s30 }
  0x23   : > { %p3230_p13 = pnand %p2613_p12, %p3198_p1 }
  0x25   : > { %p3244_p2 = pneg %p3230_p13 }
  0x28   : > { %s2834_s21 = scalar_lea.hbm %s3986_s3, 1536 }
  0x29   : > { %p2835_p0 = scmp.ne.s32.totalorder %s3986_s3, %s2834_s21  ;;  %p2841_p7 = scmp.lt.u32.totalorder %s2834_s21, %s3986_s3 }
  0x2b   : > { %p2837_p3 = pnand %p3244_p2, %p2835_p0 }
  0x2d   : > { %p2838_p5 = pneg %p2837_p3 }
  0x2f   : > { %p2843_p8 = pnand %p2841_p7, %p2838_p5 }
  0x31   : > { %2846 = shalt.err (!%p2843_p8)
}
  0x32   : > { %s2847_s16 = scalar_lea.vmem %s267_s24, 1536  ;;  %p2855_p6 = scmp.lt.s32.totalorder %s267_s24, %s267_s24 }
  0x33   : > { %p2848_p9 = scmp.ne.s32.totalorder %s267_s24, %s2847_s16  ;;  %p2856_p1 = scmp.lt.s32.totalorder %s2847_s16, %s2847_s16 }
  0x35   : > { %p2850_p12 = pnand %p2848_p9, %p3244_p2  ;;  %p2857_p4 = por %p2856_p1, %p2855_p6 }
  0x37   : > { %p2851_p10 = pneg %p2850_p12 }
  0x39   : > { %p2858_p11 = pnand %p2857_p4, %p2851_p10 }
  0x3b   : > { %2861 = shalt.err (!%p2858_p11)
}
  0x3c   : > { %s3082_s8 = smov 192   ;;  %s3083_s27 = smov 12  }
  0x3d   : > { %2616 = dma.hbm_to_vmem [thread:$0]  (!%p3230_p13), %s3986_s3, 1536, %s267_s24, [#allocation11], %s3082_s8, %s3082_s8, %s3083_s27  }
  0x3e   : > { %s3988_s4 = sld [smem:[#allocation26_spill]] }
  0x44   : > { %s2862_s7 = scalar_lea.hbm %s3988_s4, 48 }
  0x45   : > { %p2863_p0 = scmp.ne.s32.totalorder %s3988_s4, %s2862_s7  ;;  %p2869_p6 = scmp.lt.u32.totalorder %s2862_s7, %s3988_s4 }
  0x47   : > { %p2865_p1 = pnand %p2863_p0, %p3244_p2 }
  0x49   : > { %p2866_p4 = pneg %p2865_p1 }
  0x4b   : > { %p2871_p10 = pnand %p2869_p6, %p2866_p4 }
  0x4d   : > { %2874 = shalt.err (!%p2871_p10)
}
  0x4e   : > { %s2875_s24 = scalar_lea.vmem %s3234_s30, 48  ;;  %s2882_s5 = scalar_lea.vmem %s3234_s30, 64 }
  0x4f   : > { %p2876_p11 = scmp.ne.s32.totalorder %s3234_s30, %s2875_s24  ;;  %p2883_p7 = scmp.lt.s32.totalorder %s3234_s30, %s3234_s30 }
  0x50   : > { %p2884_p8 = scmp.lt.s32.totalorder %s2882_s5, %s2875_s24 }
  0x51   : > { %p2878_p3 = pnand %p2876_p11, %p3244_p2 }
  0x52   : > { %p2885_p9 = por %p2884_p8, %p2883_p7 }
  0x53   : > { %p2879_p5 = pneg %p2878_p3 }
  0x55   : > { %p2886_p12 = pnand %p2885_p9, %p2879_p5 }
  0x57   : > { %2889 = shalt.err (!%p2886_p12)
}
  0x58   : > { %2619 = dma.hbm_to_vmem [thread:$0]  (!%p3230_p13), %s3988_s4, 48, %s3234_s30, [#allocation11]  }
  0x59   : > { %s3084_s11 = smov [#allocation13]   ;;  %s2890_s21 = scalar_lea.hbm %s3955_s6, 1024 }
  0x5a   : > { %s293_s8 = sshll.u32 %s3084_s11, 4  ;;  %p2891_p0 = scmp.ne.s32.totalorder %s3955_s6, %s2890_s21  ;;  %s294_s8 = int_to_ptr.vmem [resolvable:$true] %s293_s8 }
  0x5b   : > { %p2897_p6 = scmp.lt.u32.totalorder %s2890_s21, %s3955_s6 }
  0x5c   : > { %p2893_p1 = pnand %p2891_p0, %p3244_p2 }
  0x5e   : > { %p2894_p4 = pneg %p2893_p1 }
  0x60   : > { %p2899_p10 = pnand %p2897_p6, %p2894_p4 }
  0x62   : > { %2902 = shalt.err (!%p2899_p10)
}
  0x63   : > { %s2903_s30 = scalar_lea.vmem %s294_s8, 1024  ;;  %p2911_p7 = scmp.lt.s32.totalorder %s294_s8, %s294_s8 }
  0x64   : > { %p2904_p11 = scmp.ne.s32.totalorder %s294_s8, %s2903_s30  ;;  %p2912_p8 = scmp.lt.s32.totalorder %s2903_s30, %s2903_s30 }
  0x66   : > { %p2906_p3 = pnand %p2904_p11, %p3244_p2  ;;  %p2913_p9 = por %p2912_p8, %p2911_p7 }
  0x68   : > { %p2907_p5 = pneg %p2906_p3 }
  0x6a   : > { %p2914_p12 = pnand %p2913_p9, %p2907_p5 }
  0x6c   : > { %2917 = shalt.err (!%p2914_p12)
}
  0x6d   : > { %s3085_s5 = smov 64   ;;  %s3086_s23 = smov 4  }
  0x6e   : > { %2622 = dma.hbm_to_vmem [thread:$0]  (!%p3230_p13), %s3955_s6, 1024, %s294_s8, [#allocation14], %s3085_s5, %s3085_s5, %s3086_s23  }
  0x6f   : > { %s35_s11 = sadd.s32 1, %s3070_s13  ;;  %s38_s27 = sadd.s32 1, %s3074_s14 }
  0x70   : > { %p36_p2 = scmp.ge.s32.totalorder %s35_s11, 2  ;;  %s97_s20 = sadd.s32 1, %s3058_s10 }
  0x71   : > { %p104_p0 = scmp.ne.s32.totalorder %s3058_s10, %s3054_s9  ;;  %p105_p1 = scmp.eq.s32.totalorder %s3078_s15, 0 }
  0x72   : > { %s4019_s11 = smov (%p36_p2, %s35_s11), 0  ;;  %s4021_s27 = smov (!%p36_p2, %s38_s27), %s3074_s14 }
  0x73   : > { %p3311_p4 = por %p105_p1, %p104_p0  ;;  %s226_s21 = ssub.s32 %s3070_s13, %s4019_s11 }
  0x74   : > { %p40_p13 = scmp.ge.s32.totalorder %s4021_s27, 2  ;;  %s230_s8 = sadd.s32 1, %s3046_s29 }
  0x75   : > { %p2634_p6 = scmp.lt.s32.totalorder %s3078_s15, 4  ;;  %s326_s17 = sand.u32 1, %s3058_s10  }
  0x76   : > { %s4023_s27 = smov (%p40_p13, %s4021_s27), 0  ;;  %s2251_s16 = sshll.u32 %s3074_s14, 4 }
  0x77   : > { %s94_s26 = ssub.s32 %s3074_s14, %s4023_s27  ;;  %s3328_s23 = scalar_lea.hbm %s3951_s2, %s2251_s16 }
  0x78   : > { %p95_p10 = scmp.eq.s32.totalorder %s94_s26, 0  ;;  %s227_s24 = sor.u32 %s226_s21, %s94_s26 }
  0x79   : > { %p228_p11 = scmp.eq.s32.totalorder %s227_s24, 0  ;;  %s329_s3 = scalar_lea.vmem [#allocation7], %s326_s17 }
  0x7a   : > { %s3331_s1 = scalar_select %p95_p10, %s3058_s10, %s97_s20  }
  0x7b   : > { %s3334_s7 = scalar_select %p228_p11, %s3046_s29, %s230_s8  }
  0x7c   : > { %s336_s4 = sshll.u32 %s329_s3, 4  ;;  %p3340_p3 = pnand %p2634_p6, %p3311_p4  ;;  %s3344_s4 = int_to_ptr.vmem [resolvable:$true] %s336_s4 }
  0x7d   : > { %s327_s26 = scalar_lea.sflag [#allocation8], %s326_s17  ;;  %s2918_s16 = scalar_lea.hbm %s3328_s23, 16 }
  0x7e   : > { %p2919_p5 = scmp.ne.s32.totalorder %s3328_s23, %s2918_s16  ;;  %p2920_p7 = pneg %p3340_p3 }
  0x7f   : > { %s2923_s25 = scalar_lea.hbm %s3951_s2, 32  ;;  %p2924_p12 = scmp.lt.u32.totalorder %s3328_s23, %s3951_s2 }
  0x80   : > { %p2921_p8 = pnand %p2920_p7, %p2919_p5  ;;  %p2925_p2 = scmp.lt.u32.totalorder %s2923_s25, %s2918_s16 }
  0x81   : > { %p2927_p1 = scmp.lt.u32.totalorder %s2918_s16, %s3328_s23 }
  0x82   : > { %p2922_p9 = pneg %p2921_p8  ;;  %p2926_p0 = por %p2925_p2, %p2924_p12 }
  0x84   : > { %p2928_p4 = por %p2927_p1, %p2926_p0 }
  0x86   : > { %p2929_p13 = pnand %p2928_p4, %p2922_p9 }
  0x88   : > { %2932 = shalt.err (!%p2929_p13)
}
  0x89   : > { %s2933_s17 = scalar_lea.vmem %s3344_s4, 16  ;;  %s3087_s30 = smov [#allocation7]  }
  0x8a   : > { %p2934_p6 = scmp.ne.s32.totalorder %s3344_s4, %s2933_s17  ;;  %s2938_s5 = sshll.u32 %s3087_s30, 4  ;;  %s2939_s5 = int_to_ptr.vmem [resolvable:$false] %s2938_s5 }
  0x8b   : > { %s2940_s3 = scalar_lea.vmem %s2939_s5, 32  ;;  %p2941_p5 = scmp.lt.s32.totalorder %s3344_s4, %s2939_s5 }
  0x8c   : > { %p2936_p10 = pnand %p2934_p6, %p2920_p7  ;;  %p2942_p8 = scmp.lt.s32.totalorder %s2940_s3, %s2933_s17 }
  0x8e   : > { %p2937_p11 = pneg %p2936_p10  ;;  %p2943_p12 = por %p2942_p8, %p2941_p5 }
  0x90   : > { %p2944_p2 = pnand %p2943_p12, %p2937_p11 }
  0x92   : > { %2947 = shalt.err (!%p2944_p2)
}
  0x93   : > { %2626 = dma.hbm_to_vmem [thread:$0]  (!%p3340_p3), %s3328_s23, 16, %s3344_s4, %s327_s26  }
  0x94   : > { %p3991_p9 = scmp.ne.s32.totalorder %s3984_s22, 0 }
  0x95   : > { %s347_s16 = sand.u32 (!%p3991_p9), 1, %s3054_s9   ;;  %p3992_p7 = scmp.ne.s32.totalorder (!%p3991_p9), %s3979_s19, 0 }
  0x96   : > { %345 = sbr.rel (%p3991_p9) target bundleno = 2804 (0xaf4), region = 52  ;;  %s348_s20 = scalar_lea.sflag (!%p3991_p9), [#allocation8], %s347_s16 }
  0x97   : > { %s3374_s25 = scalar_lea.vmem (!%p3991_p9), [#allocation7], %s347_s16 }
  0x9d   : > { %3021 = dma.done.wait (%p3992_p7), %s348_s20, 16  }
  0x9e   : > { %3023 = vsyncadd (%p3992_p7), %s348_s20, 4294967280  ;;  %p3993_p0 = scmp.ne.s32.totalorder %s3978_s18, 0 }
  0xa0   : > { %3025 = dma.done.wait (%p3993_p0), [#allocation11], 1584  }
  0xa1   : > { %3027 = vsyncadd (%p3993_p0), [#allocation11], 4294965712 }
  0xa2   : > { %3029 = dma.done.wait (%p3993_p0), [#allocation14], 1024  }
  0xa3   : > { %3031 = vsyncadd (%p3993_p0), [#allocation14], 4294966272  ;;  %s401_s4 = sand.u32 1, %s3042_s28   ;;  %p404_p3 = scmp.lt.s32.totalorder %s3066_s12, 1 }
  0xa4   : > { %s2256_s19 = sshll.u32 %s401_s4, 5  ;;  %s3994_s30 = sld [smem:[#allocation24_spill]] }
  0xa5   : > { %s405_s22 = scalar_select %p404_p3, %s3066_s12, 1 }
  0xa6   : > { %s3403_s5 = scalar_lea.vmem [#allocation15], %s2256_s19  ;;  %s3995_s3 = sld [smem:[#allocation21_spill]] }
  0xa7   : > { %s2381_s23 = sshll.u32 %s405_s22, 6 }
  0xa8   : > { %s3396_s8 = scalar_lea.vmem %s3949_s0, %s2381_s23 }
  0xaa   : > { %s3401_s18 = scalar_lea.vmem %s3994_s30, %s2381_s23 }
  0xac   : > { %p2261_p1 = scmp.ne.s32.totalorder %s3995_s3, 0 }
  0xad   : > { %v2744_v0 = vld [vmem:[#allocation10 + $0x4] ss:$12 sps:$4 sm:$0xff] (!%p2261_p1)   ;;  %v2746_v1 = vld [vmem:[#allocation10] ss:$12 sps:$4 sm:$0xff] (!%p2261_p1)   ;;  %v3088_v2 = vmov (!%p2261_p1), 0   ;;  %vm529_vm0 = vcmask (!%p2261_p1), 523264   ;;  %v450_v34 = vlaneseq (!%p2261_p1) }
  0xae   : > { %419 = sbr.rel (%p2261_p1) target bundleno = 435 (0x1b3), region = 72  ;;  %574 = vmatprep.mubr.bf16.mxu0 (!%p2261_p1), %v3088_v2  ;;  %2743 = vset.pattern.permute.xlu1 (!%p2261_p1), %v3088_v2  ;;  %v2747_v3 = vld [vmem:[#allocation10 + $0x8] ss:$12 sps:$4 sm:$0xff] (!%p2261_p1)   ;;  %v2750_v5 = vld [vmem:[#allocation10 + $0x18] ss:$12 sps:$4 sm:$0xff] (!%p2261_p1)   ;;  %v3089_v33 = vmov (!%p2261_p1), 0.0  }
  0xaf   : > { %542 = vmatprep.subr.bf16.mxu0 (!%p2261_p1), %v2744_v0  ;;  %2742 = vset.pattern.permute.xlu0 (!%p2261_p1), %v3088_v2  ;;  %v2748_v4 = vld [vmem:[#allocation10 + $0x1c] ss:$12 sps:$4 sm:$0xff] (!%p2261_p1)   ;;  %v2751_v6 = vld [vmem:[#allocation10 + $0x20] ss:$12 sps:$4 sm:$0xff] (!%p2261_p1)   ;;  %v2755_v8 = vld [vmem:[#allocation10 + $0x38] ss:$12 sps:$4 sm:$0xff] (!%p2261_p1)  }
  0xb0   : > { %543 = vmatpush1.bf16.msra.mxu0 (!%p2261_p1), %v2746_v1  ;;  %2449 = vmatprep.subr.bf16.mxu1 (!%p2261_p1), %v2747_v3  ;;  %v2752_v7 = vld [vmem:[#allocation10 + $0x34] ss:$12 sps:$4 sm:$0xff] (!%p2261_p1)   ;;  %v2754_v9 = vld [vmem:[#allocation10 + $0x30] ss:$12 sps:$4 sm:$0xff] (!%p2261_p1)   ;;  %v2756_v10 = vld [vmem:[#allocation10 + $0x4c] ss:$12 sps:$4 sm:$0xff] (!%p2261_p1)  }
  0xb1   : > { %2450 = vmatpush3.bf16.msra.mxu1 (!%p2261_p1), %v2747_v3  ;;  %544 = vmatprep.subr.bf16.mxu0 (!%p2261_p1), %v2748_v4  ;;  %v420_v11 = vld [vmem:[%s3396_s8] sm:$0xff] (!%p2261_p1)  ;;  %v421_v12 = vld [vmem:[%s3396_s8 + $0x8] sm:$0xff] (!%p2261_p1)  ;;  %v698_v16 = vld [vmem:[%s3401_s18 + $0x10] sm:$0xff] (!%p2261_p1)  ;;  %760 = vst [vmem:[#allocation5] sm:$0xff] (!%p2261_p1), %v3089_v33  ;;  %v451_v36 = vshrl.u32 (!%p2261_p1), %v450_v34, 7 }
  0xb2   : > { %2451 = vmatprep.subr.bf16.mxu1 (!%p2261_p1), %v2751_v6  ;;  %v2759_v13 = vld [vmem:[#allocation10 + $0x50] ss:$12 sps:$4 sm:$0xff] (!%p2261_p1)   ;;  %v428_v14 = vpack.c.bf16 (!%p2261_p1), %v421_v12, %v420_v11  ;;  %v2758_v15 = vld [vmem:[#allocation10 + $0x48] ss:$12 sps:$4 sm:$0xff] (!%p2261_p1)   ;;  %716 = vperm.xlu1 (!%p2261_p1), %2743, %v698_v16   ;;  %769 = vst [vmem:[#allocation5 + $0x48] sm:$0x1f] (!%p2261_p1), %v3089_v33 }
  0xb3   : > { %v696_v17 = vld [vmem:[%s3401_s18] sm:$0xff] (!%p2261_p1)  ;;  %v422_v18 = vld [vmem:[%s3396_s8 + $0x10] sm:$0xff] (!%p2261_p1)  ;;  %v423_v19 = vld [vmem:[%s3396_s8 + $0x18] sm:$0xff] (!%p2261_p1)  ;;  %v452_v38 = vsub.s32 (!%p2261_p1), 0, %v451_v36  ;;  %v460_v39 = vsub.s32 (!%p2261_p1), 2, %v451_v36  ;;  %v456_v42 = vsub.s32 (!%p2261_p1), 1, %v451_v36 }
  0xb4   : > { %545 = vmatpush1.bf16.msra.mxu0 (!%p2261_p1), %v2750_v5  ;;  %2457 = vmatprep.mubr.msk.bf16.mxu1 (!%p2261_p1), %vm529_vm0, %v428_v14  ;;  %v424_v20 = vld [vmem:[%s3396_s8 + $0x20] sm:$0xff] (!%p2261_p1)  ;;  %v425_v21 = vld [vmem:[%s3396_s8 + $0x28] sm:$0xff] (!%p2261_p1)  ;;  %v699_v22 = vld [vmem:[%s3401_s18 + $0x18] sm:$0xff] (!%p2261_p1)  ;;  %v429_v24 = vpack.c.bf16 (!%p2261_p1), %v423_v19, %v422_v18 }
  0xb5   : > { %546 = vmatprep.subr.bf16.mxu0 %v2752_v7  ;;  %2452 = vmatpush3.bf16.msra.mxu1 %v2751_v6  ;;  %v697_v23 = vld [vmem:[%s3401_s18 + $0x8] sm:$0xff]  ;;  %v430_v25 = vpack.c.bf16 %v425_v21, %v424_v20  ;;  %v700_v27 = vld [vmem:[%s3401_s18 + $0x20] sm:$0xff]  ;;  %v426_v28 = vld [vmem:[%s3396_s8 + $0x30] sm:$0xff] }
  0xb6   : > { %2453 = vmatprep.subr.bf16.mxu1 %v2755_v8  ;;  %706 = vperm.xlu0 %2742, %v696_v17   ;;  %v701_v26 = vld [vmem:[%s3401_s18 + $0x28] sm:$0xff]  ;;  %v427_v29 = vld [vmem:[%s3396_s8 + $0x38] sm:$0xff]  ;;  %v702_v31 = vld [vmem:[%s3401_s18 + $0x30] sm:$0xff] }
  0xb7   : > { %721 = vperm.xlu1 %2743, %v699_v22   ;;  %v703_v30 = vld [vmem:[%s3401_s18 + $0x38] sm:$0xff]  ;;  %v431_v32 = vpack.c.bf16 %v427_v29, %v426_v28  ;;  %v448_v41 = vld [vmem:[#allocation12] sm:$0x7] }
  0xb8   : > { %547 = vmatpush1.bf16.msra.mxu0 %v2754_v9  ;;  %v3436_v43 = vrot.slane %v448_v41, %v452_v38  ;;  %v461_v44 = vrot.slane %v448_v41, %v460_v39  ;;  %v3438_v46 = vrot.slane %v448_v41, %v456_v42 }
  0xb9   : > { %548 = vmatprep.subr.bf16.mxu0 %v2756_v10  ;;  %2454 = vmatpush3.bf16.msra.mxu1 %v2755_v8 }
  0xba   : > { %2455 = vmatprep.subr.bf16.mxu1 %v2759_v13  ;;  %711 = vperm.xlu0 %2742, %v697_v23  }
  0xbb   : > { %731 = vperm.xlu1 %2743, %v701_v26  }
  0xbc   : > { %549 = vmatpush1.bf16.msra.mxu0 %v2758_v15 }
  0xbd   : > { %2456 = vmatpush3.bf16.msra.mxu1 %v2759_v13 }
  0xbe   : > { %726 = vperm.xlu0 %2742, %v700_v27  }
  0xbf   : > { %2274 = vmatmul.mubr.msk.bf16.vlgmr.msra.gmra.mrb[0].mxu0 %vm529_vm0, %v428_v14  ;;  %741 = vperm.xlu1 %2743, %v703_v30  }
  0xc0   : > { %584 = vmatprep.mubr.bf16.mxu0 %v3088_v2  ;;  %2458 = vmatmul.mubr.msk.bf16.vlgmr.msra.gmra.mrb[0].mxu1 %vm529_vm0, %v429_v24 }
  0xc1   : > { %2461 = vmatprep.mubr.msk.bf16.mxu1 %vm529_vm0, %v430_v25 }
  0xc2   : > { %736 = vperm.xlu0 %2742, %v702_v31  }
  0xc7   : > { %2275 = vmatmul.mubr.msk.bf16.gmra.mrb[4].mxu0 %vm529_vm0, %v429_v24 }
  0xc8   : > { %594 = vmatprep.mubr.bf16.mxu0 %v3088_v2  ;;  %2462 = vmatmul.mubr.msk.bf16.gmra.mrb[4].mxu1 %vm529_vm0, %v431_v32 }
  0xcf   : > { %2276 = vmatmul.mubr.msk.bf16.gmra.mrb[8].mxu0 %vm529_vm0, %v430_v25 }
  0xd0   : > { %604 = vmatprep.mubr.bf16.mxu0 %v3088_v2 }
  0xd7   : > { %2277 = vmatmul.mubr.msk.bf16.gmra.mrb[12].mxu0 %vm529_vm0, %v431_v32 }
 0x131   : > { %v717_v37 = vpop.permute.xlu1 %716 }
 0x135   : > { %v707_v35 = vpop.permute.xlu0 %706 }
 0x136   : > { %v722_v47 = vpop.permute.xlu1 %721 }
 0x139   : > { %v712_v40 = vpop.permute.xlu0 %711 }
 0x13a   : > { %v732_v4 = vpop.permute.xlu1 %731 }
 0x13d   : > { %v727_v49 = vpop.permute.xlu0 %726 }
 0x13e   : > { %v742_v23 = vpop.permute.xlu1 %741 }
 0x141   : > { %v737_v10 = vpop.permute.xlu0 %736 }
 0x192   : > { %v576_v45 = vpop.f32.mrb[0].mxu0 }
 0x193   : > { %v578_v48 = vpop.f32.mrb[1].mxu0  ;;  %v2459_v51 = vpop.f32.mrb[0].mxu1  ;;  %v577_v52 = vadd.f32 %v576_v45, %v3436_v43 }
 0x194   : > { %v580_v50 = vpop.f32.mrb[2].mxu0  ;;  %v658_v55 = vadd.f32 %v2459_v51, %v461_v44  ;;  %v649_v56 = vpop.f32.mrb[1].mxu1  ;;  %v579_v57 = vadd.f32 %v578_v48, %v3438_v46 }
 0x195   : > { %v581_v53 = vadd.f32 %v580_v50, %v3436_v43  ;;  %v582_v54 = vpop.f32.mrb[3].mxu0  ;;  %v650_v59 = vadd.f32 %v649_v56, %v461_v44  ;;  %v2460_v60 = vpop.f32.mrb[2].mxu1 }
 0x196   : > { %v583_v58 = vadd.f32 %v582_v54, %v3438_v46  ;;  %v746_v62 = vmul.f32 %v717_v37, %v658_v55  ;;  %v661_v63 = vadd.f32 %v2460_v60, %v461_v44  ;;  %v652_v0 = vpop.f32.mrb[3].mxu1 }
 0x197   : > { %v680_v61 = vpack.c.bf16 %v581_v53, %v577_v52  ;;  %v744_v2 = vmul.f32 %v707_v35, %v650_v59  ;;  %v653_v3 = vadd.f32 %v652_v0, %v461_v44 }
 0x198   : > { %v688_v1 = vpack.c.bf16 %v583_v58, %v579_v57  ;;  %772 = vst [vmem:[#allocation5 + $0x18] sm:$0xff] %v746_v62  ;;  %v747_v5 = vmul.f32 %v722_v47, %v661_v63 }
 0x199   : > { %684 = vst [vmem:[#allocation2] sm:$0xff] %v680_v61  ;;  %770 = vst [vmem:[#allocation5 + $0x8] sm:$0xff] %v744_v2  ;;  %v745_v7 = vmul.f32 %v712_v40, %v653_v3 }
 0x19a   : > { %692 = vst [vmem:[#allocation3] sm:$0xff] %v688_v1  ;;  %v586_v6 = vpop.f32.mrb[4].mxu0  ;;  %v753_v8 = vpack.c.bf16 %v747_v5, %v746_v62  ;;  %773 = vst [vmem:[#allocation5 + $0x20] sm:$0xff] %v747_v5 }
 0x19b   : > { %v588_v9 = vpop.f32.mrb[5].mxu0  ;;  %v752_v11 = vpack.c.bf16 %v745_v7, %v744_v2  ;;  %771 = vst [vmem:[#allocation5 + $0x10] sm:$0xff] %v745_v7  ;;  %v2463_v13 = vpop.f32.mrb[4].mxu1  ;;  %v587_v14 = vadd.f32 %v586_v6, %v3436_v43 }
 0x19c   : > { %v590_v12 = vpop.f32.mrb[6].mxu0  ;;  %757 = vst [vmem:[#allocation4 + $0x8] sm:$0xff] %v753_v8  ;;  %v674_v16 = vadd.f32 %v2463_v13, %v461_v44  ;;  %v665_v18 = vpop.f32.mrb[5].mxu1  ;;  %v589_v19 = vadd.f32 %v588_v9, %v3438_v46 }
 0x19d   : > { %v591_v15 = vadd.f32 %v590_v12, %v3436_v43  ;;  %v592_v17 = vpop.f32.mrb[7].mxu0  ;;  %756 = vst [vmem:[#allocation4] sm:$0xff] %v752_v11  ;;  %v666_v21 = vadd.f32 %v665_v18, %v461_v44  ;;  %v2464_v22 = vpop.f32.mrb[6].mxu1 }
 0x19e   : > { %v593_v20 = vadd.f32 %v592_v17, %v3438_v46  ;;  %v677_v25 = vadd.f32 %v2464_v22, %v461_v44  ;;  %v668_v26 = vpop.f32.mrb[7].mxu1  ;;  %v750_v27 = vmul.f32 %v737_v10, %v674_v16 }
 0x19f   : > { %v681_v24 = vpack.c.bf16 %v591_v15, %v587_v14  ;;  %v748_v29 = vmul.f32 %v727_v49, %v666_v21  ;;  %v669_v30 = vadd.f32 %v668_v26, %v461_v44 }
 0x1a0   : > { %v689_v28 = vpack.c.bf16 %v593_v20, %v589_v19  ;;  %v751_v31 = vmul.f32 %v742_v23, %v677_v25  ;;  %776 = vst [vmem:[#allocation5 + $0x38] sm:$0xff] %v750_v27 }
 0x1a1   : > { %685 = vst [vmem:[#allocation2 + $0x8] sm:$0xff] %v681_v24  ;;  %774 = vst [vmem:[#allocation5 + $0x28] sm:$0xff] %v748_v29  ;;  %v749_v32 = vmul.f32 %v732_v4, %v669_v30 }
 0x1a2   : > { %693 = vst [vmem:[#allocation3 + $0x8] sm:$0xff] %v689_v28  ;;  %v596_v33 = vpop.f32.mrb[8].mxu0  ;;  %777 = vst [vmem:[#allocation5 + $0x40] sm:$0xff] %v751_v31  ;;  %v755_v34 = vpack.c.bf16 %v751_v31, %v750_v27 }
 0x1a3   : > { %v598_v35 = vpop.f32.mrb[9].mxu0  ;;  %v754_v36 = vpack.c.bf16 %v749_v32, %v748_v29  ;;  %775 = vst [vmem:[#allocation5 + $0x30] sm:$0xff] %v749_v32  ;;  %v597_v38 = vadd.f32 %v596_v33, %v3436_v43 }
 0x1a4   : > { %v600_v37 = vpop.f32.mrb[10].mxu0  ;;  %759 = vst [vmem:[#allocation4 + $0x18] sm:$0xff] %v755_v34  ;;  %v599_v41 = vadd.f32 %v598_v35, %v3438_v46 }
 0x1a5   : > { %v601_v39 = vadd.f32 %v600_v37, %v3436_v43  ;;  %v602_v40 = vpop.f32.mrb[11].mxu0  ;;  %758 = vst [vmem:[#allocation4 + $0x10] sm:$0xff] %v754_v36 }
 0x1a6   : > { %v603_v42 = vadd.f32 %v602_v40, %v3438_v46 }
 0x1a7   : > { %v682_v44 = vpack.c.bf16 %v601_v39, %v597_v38 }
 0x1a8   : > { %v690_v45 = vpack.c.bf16 %v603_v42, %v599_v41 }
 0x1a9   : > { %686 = vst [vmem:[#allocation2 + $0x10] sm:$0xff] %v682_v44 }
 0x1aa   : > { %694 = vst [vmem:[#allocation3 + $0x10] sm:$0xff] %v690_v45  ;;  %v606_v47 = vpop.f32.mrb[12].mxu0 }
 0x1ab   : > { %v608_v48 = vpop.f32.mrb[13].mxu0  ;;  %v607_v50 = vadd.f32 %v606_v47, %v3436_v43 }
 0x1ac   : > { %v610_v49 = vpop.f32.mrb[14].mxu0  ;;  %v609_v53 = vadd.f32 %v608_v48, %v3438_v46 }
 0x1ad   : > { %v611_v51 = vadd.f32 %v610_v49, %v3436_v43  ;;  %v612_v52 = vpop.f32.mrb[15].mxu0 }
 0x1ae   : > { %v613_v54 = vadd.f32 %v612_v52, %v3438_v46 }
 0x1af   : > { %v683_v55 = vpack.c.bf16 %v611_v51, %v607_v50 }
 0x1b0   : > { %v691_v56 = vpack.c.bf16 %v613_v54, %v609_v53 }
 0x1b1   : > { %687 = vst [vmem:[#allocation2 + $0x18] sm:$0xff] %v683_v55 }
 0x1b2   : > { %695 = vst [vmem:[#allocation3 + $0x18] sm:$0xff] %v691_v56 }
 0x1b3 PF: > { %v3456_v57 = vld [vmem:[#allocation3] sm:$0xff]  ;;  %s3996_s16 = sld [smem:[#allocation21_spill]]  ;;  %vm1037_vm1 = vcmask 261120   ;;  %v3458_v58 = vld [vmem:[#allocation3 + $0x8] sm:$0xff]  ;;  %v3090_v46 = vmov 0   ;;  %v3476_v61 = vld [vmem:[#allocation3 + $0x10] sm:$0xff]  ;;  %v1106_v2 = vlaneseq }
 0x1b4   : > { %2581 = vmatprep.subr.msk.bf16.mxu0 %vm1037_vm1, %v3456_v57  ;;  %v1045_v43 = vsel %vm1037_vm1, %v3456_v57, 0  ;;  %2761 = vset.pattern.permute.xlu1 %v3090_v46  ;;  %v1048_v59 = vsel %vm1037_vm1, %v3458_v58, 0  ;;  %v1051_v62 = vsel %vm1037_vm1, %v3476_v61, 0  ;;  %v1021_v3 = vld [vmem:[%s3374_s25] sm:$0x1]  ;;  %vm1115_vm4 = vcmask 523264  }
 0x1b5   : > { %2466 = vmatpush3.bf16.xpose.msra.mxu0 %v1045_v43  ;;  %2760 = vset.pattern.permute.xlu0 %v3090_v46  ;;  %v1107_v4 = vshrl.u32 %v1106_v2, 7  ;;  %vm1022_vm2 = vcmp.eq.f32.partialorder %v1021_v3, 0.0  ;;  %v3512_v40 = vld [vmem:[#allocation4] sm:$0xff]  ;;  %v3516_v41 = vld [vmem:[#allocation4 + $0x8] sm:$0xff]  ;;  %v3520_v42 = vld [vmem:[#allocation4 + $0x10] sm:$0xff]  ;;  %s3091_s25 = smov 96  }
 0x1b6   : > { %2582 = vmatprep.subr.msk.bf16.mxu0 %vm1037_vm1, %v3458_v58  ;;  %v1105_v6 = vsel %vm1022_vm2, 1, %v3090_v46  ;;  %2477 = vmatprep.subr.bf16.mxu1 %v3512_v40  ;;  %v3528_v44 = vld [vmem:[#allocation4 + $0x18] sm:$0xff]  ;;  %s3092_s21 = smov 64   ;;  %s3093_s26 = smov 32   ;;  %vm1455_vm5 = vcmask 523520   ;;  %vm1688_vm6 = vcmask 785920  }
 0x1b7   : > { %v1108_v5 = vsub.s32 0, %v1107_v4  ;;  %2478 = vmatpush3.bf16.msra.mxu1 %v3512_v40  ;;  %vm1921_vm7 = vcmask 1048320   ;;  %s3997_s30 = sld [smem:[#allocation27_spill]]  ;;  %s3888_s24 = scalar_lea.sflag [#allocation9], %s401_s4 }
 0x1b8   : > { %2479 = vmatprep.subr.bf16.mxu1 %v3516_v41 }
 0x1b9   : > { %s3461_s20 = sshll.u32 %s3996_s16, 5  ;;  %v3482_v63 = vld [vmem:[#allocation3 + $0x18] sm:$0xff]  ;;  %v3493_v7 = vrot.slane %v1105_v6, %v1108_v5  ;;  %s2376_s17 = sshll.u32 %s3996_s16, 2 }
 0x1ba   : > { %s1023_s19 = sshra.s32 %s3461_s20, 4  ;;  %v1054_v0 = vsel %vm1037_vm1, %v3482_v63, 0  ;;  %s988_s8 = scalar_lea.vmem %s3401_s18, %s3461_s20 }
 0x1bb   : > { %s2349_s22 = sshll.u32 %s1023_s19, 3  ;;  %vm1110_vm3 = vcmp.eq.s32.totalorder %v3493_v7, 1  ;;  %2480 = vmatpush3.bf16.msra.mxu1 %v3516_v41  ;;  %v2767_v7 = vld [vmem:[#allocation13 + $0x28] sm:$0xff]   ;;  %s3999_s19 = sld [smem:[#allocation28_spill]] }
 0x1bc   : > { %s1026_s23 = scalar_lea.vmem [#allocation2], %s2349_s22  ;;  %2481 = vmatprep.subr.bf16.mxu1 %v3520_v42  ;;  %s3753_s22 = scalar_lea.vmem [#allocation5], %s3461_s20 }
 0x1bd   : > { %v3472_v60 = vld [vmem:[%s1026_s23] sm:$0xff]  ;;  %2468 = vmatpush3.bf16.xpose.msra.mxu0 %v1048_v59  ;;  %v3488_v1 = vld [vmem:[%s1026_s23 + $0x8] sm:$0xff]  ;;  %s3998_s18 = smov %s3997_s30  ;;  %s2070_s16 = sshll.u32 %s3403_s5, 4  ;;  %s3881_s16 = int_to_ptr.vmem [resolvable:$true] %s2070_s16 }
 0x1be   : > { %2473 = vmatprep.mubr.msk.bf16.mxu0 %vm1037_vm1, %v3472_v60  ;;  %2583 = vmatprep.subr.msk.bf16.mxu0 %vm1037_vm1, %v3476_v61 }
 0x1bf   : > { %2482 = vmatpush3.bf16.msra.mxu1 %v3520_v42 }
 0x1c0   : > { %2483 = vmatprep.subr.bf16.mxu1 %v3528_v44 }
 0x1c3   : > { %2484 = vmatpush3.bf16.msra.mxu1 %v3528_v44 }
 0x1c5   : > { %2470 = vmatpush3.bf16.xpose.msra.mxu0 %v1051_v62 }
 0x1c6   : > { %2584 = vmatprep.subr.msk.bf16.mxu0 %vm1037_vm1, %v3482_v63 }
 0x1cd   : > { %2472 = vmatpush3.bf16.xpose.msra.mxu0 %v1054_v0 }
 0x1d4   : > { %2474 = vmatmul.mubr.msk.bf16.vlgmr.msra.gmra.mrb[0].mxu0 %vm1037_vm1, %v3488_v1 }
 0x2a7   : > { %v2475_v8 = vpop.f32.mrb[0].mxu0 }
 0x2a8   : > { %v1113_v9 = vsel %vm1110_vm3, -1e+30, %v2475_v8  ;;  %v1090_v10 = vpop.f32.mrb[1].mxu0 }
 0x2a9   : > { %v1111_v11 = vsel %vm1110_vm3, -1e+30, %v1090_v10  ;;  %v2476_v12 = vpop.f32.mrb[2].mxu0  ;;  %v1122_v13 = vsel %vm1115_vm4, %v1113_v9, -inf }
 0x2aa   : > { %v1114_v14 = vsel %vm1110_vm3, -1e+30, %v2476_v12  ;;  %1123 = vmax.xlane.f32.xlu1 %v1122_v13  ;;  %v1093_v15 = vpop.f32.mrb[3].mxu0  ;;  %v1116_v16 = vsel %vm1115_vm4, %v1111_v11, -inf }
 0x2ab   : > { %v1112_v17 = vsel %vm1110_vm3, -1e+30, %v1093_v15  ;;  %1117 = vmax.xlane.f32.xlu0 %v1116_v16  ;;  %v1125_v18 = vsel %vm1115_vm4, %v1114_v14, -inf }
 0x2ac   : > { %v1119_v19 = vsel %vm1115_vm4, %v1112_v17, -inf }
 0x2ae   : > { %1126 = vmax.xlane.f32.xlu1 %v1125_v18 }
 0x2af   : > { %1120 = vmax.xlane.f32.xlu0 %v1119_v19 }
 0x337   : > { %v1124_v20 = vpop.xlane.xlu1 %1123 }
 0x338   : > { %v1130_v21 = vsub.f32 %v1113_v9, %v1124_v20  ;;  %v1118_v22 = vpop.xlane.xlu0 %1117 }
 0x339   : > { %v1128_v23 = vsub.f32 %v1111_v11, %v1118_v22 }
 0x33a   : > { %v1136_v24 = vmul.f32 1.442695, %v1130_v21 }
 0x33b   : > { %v1132_v25 = vmul.f32 1.442695, %v1128_v23  ;;  %v1127_v26 = vpop.xlane.xlu1 %1126 }
 0x33c   : > { %2770 = vpow2.f32 %v1136_v24  ;;  %v1131_v27 = vsub.f32 %v1114_v14, %v1127_v26  ;;  %v1121_v28 = vpop.xlane.xlu0 %1120 }
 0x33d   : > { %v1129_v29 = vsub.f32 %v1112_v17, %v1121_v28  ;;  %2772 = vpow2.f32 %v1132_v25 }
 0x33e   : > { %v1138_v30 = vmul.f32 1.442695, %v1131_v27 }
 0x33f   : > { %v1134_v31 = vmul.f32 1.442695, %v1129_v29 }
 0x341   : > { %2774 = vpow2.f32 %v1134_v31 }
 0x342   : > { %2776 = vpow2.f32 %v1138_v30 }
 0x346   : > { %v2771_v32 = vpop.eup %2770 }
 0x347   : > { %v1146_v33 = vsel %vm1115_vm4, %v2771_v32, 0.0  ;;  %v2773_v34 = vpop.eup %2772 }
 0x348   : > { %1147 = vadd.xlane.f32.xlu0 %v1146_v33  ;;  %v1140_v36 = vsel %vm1115_vm4, %v2773_v34, 0.0 }
 0x34b   : > { %v2775_v35 = vpop.eup %2774 }
 0x34c   : > { %1141 = vadd.xlane.f32.xlu0 %v1140_v36  ;;  %v1143_v37 = vsel %vm1115_vm4, %v2775_v35, 0.0  ;;  %v2777_v38 = vpop.eup %2776 }
 0x34d   : > { %1144 = vadd.xlane.f32.xlu1 %v1143_v37  ;;  %v1149_v39 = vsel %vm1115_vm4, %v2777_v38, 0.0 }
 0x351   : > { %1150 = vadd.xlane.f32.xlu1 %v1149_v39 }
 0x362   : > { %1247 = vrot.lane.b32.xlu1 %v3458_v58, %s3091_s25  ;;  %1245 = vrot.lane.b32.xlu0 %v3456_v57, %s3091_s25 }
 0x366   : > { %1249 = vrot.lane.b32.xlu1 %v3476_v61, %s3091_s25  ;;  %1251 = vrot.lane.b32.xlu0 %v3482_v63, %s3091_s25 }
 0x36a   : > { %1478 = vrot.lane.b32.xlu1 %v3456_v57, %s3092_s21  ;;  %1237 = vrot.lane.b32.xlu0 %v3472_v60, %s3091_s25 }
 0x36e   : > { %1480 = vrot.lane.b32.xlu1 %v3458_v58, %s3092_s21  ;;  %1482 = vrot.lane.b32.xlu0 %v3476_v61, %s3092_s21 }
 0x372   : > { %1239 = vrot.lane.b32.xlu1 %v3488_v1, %s3091_s25  ;;  %1470 = vrot.lane.b32.xlu0 %v3472_v60, %s3092_s21 }
 0x376   : > { %1484 = vrot.lane.b32.xlu1 %v3482_v63, %s3092_s21 }
 0x37a   : > { %1472 = vrot.lane.b32.xlu1 %v3488_v1, %s3092_s21 }
 0x3d5   : > { %v1148_v45 = vpop.xlane.xlu0 %1147 }
 0x3d6   : > { %2778 = vrcp.f32 %v1148_v45 }
 0x3d9   : > { %v1142_v47 = vpop.xlane.xlu0 %1141 }
 0x3da   : > { %2780 = vrcp.f32 %v1142_v47  ;;  %v1145_v48 = vpop.xlane.xlu1 %1144 }
 0x3db   : > { %2782 = vrcp.f32 %v1145_v48 }
 0x3dd   : > { %v1246_v49 = vpop.permute.xlu0 %1245 }
 0x3de   : > { %v1151_v50 = vpop.xlane.xlu1 %1150  ;;  %2585 = vmatprep.subr.msk.bf16.mxu1 %vm1037_vm1, %v1246_v49  ;;  %v1260_v12 = vsel %vm1037_vm1, %v1246_v49, 0 }
 0x3df   : > { %2784 = vrcp.f32 %v1151_v50 }
 0x3e0   : > { %v2779_v53 = vpop.eup %2778 }
 0x3e1   : > { %v1252_v51 = vpop.permute.xlu0 %1251  ;;  %v1158_v2 = vmul.f32 %v2779_v53, %v2771_v32 }
 0x3e2   : > { %v1248_v52 = vpop.permute.xlu1 %1247  ;;  %v1269_v23 = vsel %vm1037_vm1, %v1252_v51, 0 }
 0x3e3   : > { %v1162_v10 = vsel %vm1110_vm3, 0.0, %v1158_v2  ;;  %v1263_v18 = vsel %vm1037_vm1, %v1248_v52, 0 }
 0x3e4   : > { %v2781_v54 = vpop.eup %2780 }
 0x3e5   : > { %v2783_v55 = vpop.eup %2782  ;;  %v1156_v56 = vmul.f32 %v2781_v54, %v2773_v34  ;;  %v1238_v43 = vpop.permute.xlu0 %1237 }
 0x3e6   : > { %v1250_v46 = vpop.permute.xlu1 %1249  ;;  %v1157_v59 = vmul.f32 %v2783_v55, %v2775_v35 }
 0x3e7   : > { %v1160_v62 = vsel %vm1110_vm3, 0.0, %v1156_v56  ;;  %v1266_v21 = vsel %vm1037_vm1, %v1250_v46, 0 }
 0x3e8   : > { %v1161_v0 = vsel %vm1110_vm3, 0.0, %v1157_v59 }
 0x3e9   : > { %v2785_v3 = vpop.eup %2784  ;;  %v1164_v4 = vpack.c.bf16 %v1161_v0, %v1160_v62  ;;  %v1483_v5 = vpop.permute.xlu0 %1482 }
 0x3ea   : > { %v1479_v6 = vpop.permute.xlu1 %1478  ;;  %v1159_v8 = vmul.f32 %v2785_v3, %v2777_v38  ;;  %v1499_v19 = vsel %vm1037_vm1, %v1483_v5, 0 }
 0x3eb   : > { %v1493_v9 = vsel %vm1037_vm1, %v1479_v6, 0  ;;  %2485 = vmatprep.mubr.msk.bf16.mxu1 %vm1115_vm4, %v1164_v4  ;;  %2589 = vmatprep.subr.msk.bf16.mxu0 %vm1037_vm1, %v1479_v6 }
 0x3ec   : > { %2514 = vmatpush3.bf16.xpose.msra.mxu0 %v1493_v9  ;;  %v1163_v11 = vsel %vm1110_vm3, 0.0, %v1159_v8 }
 0x3ed   : > { %v1165_v13 = vpack.c.bf16 %v1163_v11, %v1162_v10  ;;  %v1471_v14 = vpop.permute.xlu0 %1470 }
 0x3ee   : > { %v1481_v15 = vpop.permute.xlu1 %1480  ;;  %2521 = vmatprep.mubr.msk.bf16.mxu0 %vm1037_vm1, %v1471_v14 }
 0x3ef   : > { %2486 = vmatmul.mubr.msk.bf16.vlgmr.msra.gmra.mrb[0].mxu1 %vm1115_vm4, %v1165_v13  ;;  %2590 = vmatprep.subr.msk.bf16.mxu0 %vm1037_vm1, %v1481_v15  ;;  %v1496_v16 = vsel %vm1037_vm1, %v1481_v15, 0 }
 0x3f0   : > { %2490 = vmatpush3.bf16.xpose.msra.mxu1 %v1260_v12  ;;  %2497 = vmatprep.mubr.msk.bf16.mxu1 %vm1037_vm1, %v1238_v43 }
 0x3f1   : > { %2586 = vmatprep.subr.msk.bf16.mxu1 %vm1037_vm1, %v1248_v52 }
 0x3f2   : > { %v1240_v17 = vpop.permute.xlu1 %1239 }
 0x3f4   : > { %2516 = vmatpush3.bf16.xpose.msra.mxu0 %v1496_v16 }
 0x3f5   : > { %2591 = vmatprep.subr.msk.bf16.mxu0 %vm1037_vm1, %v1483_v5 }
 0x3f6   : > { %v1485_v20 = vpop.permute.xlu1 %1484 }
 0x3f7   : > { %v1502_v22 = vsel %vm1037_vm1, %v1485_v20, 0 }
 0x3f8   : > { %2492 = vmatpush3.bf16.xpose.msra.mxu1 %v1263_v18 }
 0x3f9   : > { %2587 = vmatprep.subr.msk.bf16.mxu1 %vm1037_vm1, %v1250_v46 }
 0x3fa   : > { %v1473_v24 = vpop.permute.xlu1 %1472 }
 0x3fc   : > { %2518 = vmatpush3.bf16.xpose.msra.mxu0 %v1499_v19 }
 0x3fd   : > { %2592 = vmatprep.subr.msk.bf16.mxu0 %vm1037_vm1, %v1485_v20 }
 0x400   : > { %2494 = vmatpush3.bf16.xpose.msra.mxu1 %v1266_v21 }
 0x401   : > { %2588 = vmatprep.subr.msk.bf16.mxu1 %vm1037_vm1, %v1252_v51 }
 0x404   : > { %2520 = vmatpush3.bf16.xpose.msra.mxu0 %v1502_v22 }
 0x408   : > { %2496 = vmatpush3.bf16.xpose.msra.mxu1 %v1269_v23 }
 0x40b   : > { %2522 = vmatmul.mubr.msk.bf16.vlgmr.msra.gmra.mrb[4].mxu0 %vm1037_vm1, %v1473_v24 }
 0x40f   : > { %2498 = vmatmul.mubr.msk.bf16.vlgmr.msra.gmra.mrb[4].mxu1 %vm1037_vm1, %v1240_v17 }
 0x4c2   : > { %v2487_v25 = vpop.f32.mrb[0].mxu1 }
 0x4c3   : > { %v1206_v26 = vpop.f32.mrb[1].mxu1 }
 0x4c4   : > { %v2488_v27 = vpop.f32.mrb[2].mxu1 }
 0x4c5   : > { %v1222_v28 = vpack.c.bf16 %v2488_v27, %v2487_v25  ;;  %v1209_v29 = vpop.f32.mrb[3].mxu1 }
 0x4c6   : > { %v1221_v30 = vpack.c.bf16 %v1209_v29, %v1206_v26 }
 0x4c7   : > { %1224 = vst.msk [vmem:[#allocation6 + $0x8] sm:$0xff] %vm1037_vm1, %v1222_v28 }
 0x4c8   : > { %1223 = vst.msk [vmem:[#allocation6] sm:$0xff] %vm1037_vm1, %v1221_v30 }
 0x4de   : > { %v2523_v31 = vpop.f32.mrb[4].mxu0 }
 0x4df   : > { %v1538_v32 = vpop.f32.mrb[5].mxu0  ;;  %v1555_v37 = vsel %vm1110_vm3, -1e+30, %v2523_v31 }
 0x4e0   : > { %v1553_v33 = vsel %vm1110_vm3, -1e+30, %v1538_v32  ;;  %v2524_v34 = vpop.f32.mrb[6].mxu0  ;;  %v1563_v51 = vsel %vm1115_vm4, %v1555_v37, -inf }
 0x4e1   : > { %v1541_v35 = vpop.f32.mrb[7].mxu0  ;;  %v1557_v36 = vsel %vm1115_vm4, %v1553_v33, -inf  ;;  %v1556_v48 = vsel %vm1110_vm3, -1e+30, %v2524_v34 }
 0x4e2   : > { %v2499_v38 = vpop.f32.mrb[4].mxu1  ;;  %v1554_v39 = vsel %vm1110_vm3, -1e+30, %v1541_v35  ;;  %1558 = vmax.xlane.f32.xlu0 %v1557_v36  ;;  %v1566_v53 = vsel %vm1115_vm4, %v1556_v48, -inf }
 0x4e3   : > { %v1305_v45 = vpop.f32.mrb[5].mxu1  ;;  %v1560_v47 = vsel %vm1115_vm4, %v1554_v39, -inf  ;;  %v1322_v52 = vsel %vm1110_vm3, -1e+30, %v2499_v38 }
 0x4e4   : > { %v2500_v49 = vpop.f32.mrb[6].mxu1  ;;  %1561 = vmax.xlane.f32.xlu1 %v1560_v47  ;;  %v1330_v55 = vsel %vm1115_vm4, %v1322_v52, -inf  ;;  %v1320_v56 = vsel %vm1110_vm3, -1e+30, %v1305_v45 }
 0x4e5   : > { %v1308_v50 = vpop.f32.mrb[7].mxu1  ;;  %v1324_v46 = vsel %vm1115_vm4, %v1320_v56, -inf  ;;  %v1323_v59 = vsel %vm1110_vm3, -1e+30, %v2500_v49 }
 0x4e6   : > { %1564 = vmax.xlane.f32.xlu0 %v1563_v51  ;;  %v3600_v54 = vsel %vm1110_vm3, -1e+30, %v1308_v50  ;;  %v1333_v62 = vsel %vm1115_vm4, %v1323_v59, -inf }
 0x4e7   : > { %v1327_v43 = vsel %vm1115_vm4, %v3600_v54, -inf }
 0x4e8   : > { %1567 = vmax.xlane.f32.xlu1 %v1566_v53 }
 0x4ea   : > { %1331 = vmax.xlane.f32.xlu0 %v1330_v55 }
 0x4ec   : > { %1328 = vmax.xlane.f32.xlu1 %v1327_v43 }
 0x4ee   : > { %1325 = vmax.xlane.f32.xlu0 %v1324_v46 }
 0x4f2   : > { %1334 = vmax.xlane.f32.xlu0 %v1333_v62 }
 0x4fd   : > { %1380 = vrot.lane.b32.xlu1 %v3516_v41, %s3091_s25 }
 0x508   : > { %1378 = vrot.lane.b32.xlu0 %v3512_v40, %s3091_s25 }
 0x56f   : > { %v1559_v0 = vpop.xlane.xlu0 %1558 }
 0x570   : > { %v1569_v2 = vsub.f32 %v1553_v33, %v1559_v0 }
 0x571   : > { %v1562_v3 = vpop.xlane.xlu1 %1561 }
 0x572   : > { %v1573_v4 = vmul.f32 1.442695, %v1569_v2  ;;  %v1570_v5 = vsub.f32 %v1554_v39, %v1562_v3 }
 0x573   : > { %v1565_v6 = vpop.xlane.xlu0 %1564 }
 0x574   : > { %2786 = vpow2.f32 %v1573_v4  ;;  %v1575_v8 = vmul.f32 1.442695, %v1570_v5  ;;  %v1571_v9 = vsub.f32 %v1555_v37, %v1565_v6 }
 0x575   : > { %v1568_v10 = vpop.xlane.xlu1 %1567 }
 0x576   : > { %2788 = vpow2.f32 %v1575_v8  ;;  %v1577_v11 = vmul.f32 1.442695, %v1571_v9  ;;  %v1572_v12 = vsub.f32 %v1556_v48, %v1568_v10 }
 0x577   : > { %v1332_v13 = vpop.xlane.xlu0 %1331 }
 0x578   : > { %2790 = vpow2.f32 %v1577_v11  ;;  %v1579_v14 = vmul.f32 1.442695, %v1572_v12  ;;  %v1338_v28 = vsub.f32 %v1322_v52, %v1332_v13 }
 0x579   : > { %v1329_v17 = vpop.xlane.xlu1 %1328 }
 0x57a   : > { %2792 = vpow2.f32 %v1579_v14  ;;  %v1344_v29 = vmul.f32 1.442695, %v1338_v28  ;;  %v1337_v33 = vsub.f32 %v3600_v54, %v1329_v17 }
 0x57b   : > { %v1326_v15 = vpop.xlane.xlu0 %1325 }
 0x57c   : > { %v1336_v30 = vsub.f32 %v1320_v56, %v1326_v15  ;;  %2794 = vpow2.f32 %v1344_v29  ;;  %v1342_v35 = vmul.f32 1.442695, %v1337_v33 }
 0x57d   : > { %v1381_v25 = vpop.permute.xlu1 %1380 }
 0x57e   : > { %v3615_v16 = vpop.eup %2786  ;;  %v1340_v32 = vmul.f32 1.442695, %v1336_v30 }
 0x57f   : > { %v1335_v18 = vpop.xlane.xlu0 %1334  ;;  %v1581_v19 = vsel %vm1115_vm4, %v3615_v16, 0.0 }
 0x580   : > { %v3619_v20 = vpop.eup %2788  ;;  %1582 = vadd.xlane.f32.xlu1 %v1581_v19  ;;  %v1339_v31 = vsub.f32 %v1323_v59, %v1335_v18  ;;  %2796 = vpow2.f32 %v1340_v32 }
 0x581   : > { %v1584_v21 = vsel %vm1115_vm4, %v3619_v20, 0.0 }
 0x582   : > { %v3623_v22 = vpop.eup %2790  ;;  %1585 = vadd.xlane.f32.xlu0 %v1584_v21  ;;  %v1346_v34 = vmul.f32 1.442695, %v1339_v31 }
 0x583   : > { %v1587_v23 = vsel %vm1115_vm4, %v3623_v22, 0.0  ;;  %v1379_v24 = vpop.permute.xlu0 %1378 }
 0x584   : > { %v3627_v26 = vpop.eup %2792  ;;  %1588 = vadd.xlane.f32.xlu1 %v1587_v23  ;;  %2501 = vmatprep.subr.bf16.mxu1 %v1379_v24  ;;  %2798 = vpow2.f32 %v1346_v34 }
 0x585   : > { %2502 = vmatpush3.bf16.msra.mxu1 %v1379_v24  ;;  %v1590_v27 = vsel %vm1115_vm4, %v3627_v26, 0.0  ;;  %2800 = vpow2.f32 %v1342_v35 }
 0x586   : > { %2503 = vmatprep.subr.bf16.mxu1 %v1381_v25  ;;  %v3636_v36 = vpop.eup %2794 }
 0x587   : > { %v1354_v37 = vsel %vm1115_vm4, %v3636_v36, 0.0 }
 0x588   : > { %1591 = vadd.xlane.f32.xlu1 %v1590_v27 }
 0x589   : > { %2504 = vmatpush3.bf16.msra.mxu1 %v1381_v25 }
 0x58a   : > { %v3640_v38 = vpop.eup %2796 }
 0x58b   : > { %v1348_v45 = vsel %vm1115_vm4, %v3640_v38, 0.0 }
 0x58e   : > { %v2799_v39 = vpop.eup %2798 }
 0x58f   : > { %v1357_v47 = vsel %vm1115_vm4, %v2799_v39, 0.0  ;;  %v2801_v48 = vpop.eup %2800 }
 0x590   : > { %v1351_v49 = vsel %vm1115_vm4, %v2801_v48, 0.0 }
 0x598   : > { %1382 = vrot.lane.b32.xlu0 %v3520_v42, %s3091_s25 }
 0x599   : > { %1384 = vrot.lane.b32.xlu1 %v3528_v44, %s3091_s25 }
 0x5b7   : > { %1355 = vadd.xlane.f32.xlu0 %v1354_v37 }
 0x5bb   : > { %1349 = vadd.xlane.f32.xlu0 %v1348_v45 }
 0x5bd   : > { %1358 = vadd.xlane.f32.xlu1 %v1357_v47 }
 0x5c1   : > { %1352 = vadd.xlane.f32.xlu1 %v1351_v49 }
 0x5d1   : > { %1611 = vrot.lane.b32.xlu0 %v3512_v40, %s3092_s21 }
 0x5d2   : > { %1613 = vrot.lane.b32.xlu1 %v3516_v41, %s3092_s21 }
 0x5d5   : > { %1615 = vrot.lane.b32.xlu0 %v3520_v42, %s3092_s21 }
 0x5d6   : > { %1617 = vrot.lane.b32.xlu1 %v3528_v44, %s3092_s21 }
 0x5d9   : > { %1711 = vrot.lane.b32.xlu0 %v3456_v57, %s3093_s26 }
 0x5da   : > { %1713 = vrot.lane.b32.xlu1 %v3458_v58, %s3093_s26 }
 0x5dd   : > { %1715 = vrot.lane.b32.xlu0 %v3476_v61, %s3093_s26 }
 0x5de   : > { %1717 = vrot.lane.b32.xlu1 %v3482_v63, %s3093_s26 }
 0x5e1   : > { %1703 = vrot.lane.b32.xlu0 %v3472_v60, %s3093_s26 }
 0x5e2   : > { %1705 = vrot.lane.b32.xlu1 %v3488_v1, %s3093_s26 }
 0x60d   : > { %v1583_v50 = vpop.xlane.xlu1 %1582 }
 0x60e   : > { %2802 = vrcp.f32 %v1583_v50 }
 0x60f   : > { %v1586_v51 = vpop.xlane.xlu0 %1585 }
 0x610   : > { %2804 = vrcp.f32 %v1586_v51 }
 0x611   : > { %v1589_v57 = vpop.xlane.xlu1 %1588 }
 0x612   : > { %2806 = vrcp.f32 %v1589_v57 }
 0x613   : > { %v1383_v52 = vpop.permute.xlu0 %1382 }
 0x614   : > { %2505 = vmatprep.subr.bf16.mxu1 %v1383_v52 }
 0x615   : > { %2506 = vmatpush3.bf16.msra.mxu1 %v1383_v52  ;;  %v1592_v58 = vpop.xlane.xlu1 %1591 }
 0x616   : > { %2808 = vrcp.f32 %v1592_v58 }
 0x618   : > { %v2803_v61 = vpop.eup %2802 }
 0x619   : > { %v1385_v53 = vpop.permute.xlu1 %1384  ;;  %v1597_v63 = vmul.f32 %v2803_v61, %v3615_v16 }
 0x61a   : > { %v2805_v54 = vpop.eup %2804  ;;  %2507 = vmatprep.subr.bf16.mxu1 %v1385_v53 }
 0x61b   : > { %2508 = vmatpush3.bf16.msra.mxu1 %v1385_v53  ;;  %v1598_v60 = vmul.f32 %v2805_v54, %v3619_v20  ;;  %v1601_v55 = vsel %vm1110_vm3, 0.0, %v1597_v63 }
 0x61c   : > { %v2807_v1 = vpop.eup %2806 }
 0x61d   : > { %v1602_v56 = vsel %vm1110_vm3, 0.0, %v1598_v60  ;;  %v1599_v46 = vmul.f32 %v2807_v1, %v3623_v22 }
 0x61e   : > { %v1605_v43 = vpack.c.bf16 %v1602_v56, %v1601_v55 }
 0x61f   : > { %v1603_v0 = vsel %vm1110_vm3, 0.0, %v1599_v46 }
 0x620   : > { %v2809_v59 = vpop.eup %2808 }
 0x621   : > { %v1600_v62 = vmul.f32 %v2809_v59, %v3627_v26 }
 0x623   : > { %v1604_v2 = vsel %vm1110_vm3, 0.0, %v1600_v62 }
 0x624   : > { %v1606_v3 = vpack.c.bf16 %v1604_v2, %v1603_v0 }
 0x644   : > { %v1356_v4 = vpop.xlane.xlu0 %1355 }
 0x648   : > { %v1350_v5 = vpop.xlane.xlu0 %1349 }
 0x649   : > { %2810 = vrcp.f32 %v1350_v5 }
 0x64a   : > { %v1359_v6 = vpop.xlane.xlu1 %1358 }
 0x64b   : > { %2812 = vrcp.f32 %v1359_v6 }
 0x64c   : > { %2814 = vrcp.f32 %v1356_v4  ;;  %v1612_v8 = vpop.permute.xlu0 %1611 }
 0x64d   : > { %2525 = vmatprep.subr.bf16.mxu1 %v1612_v8 }
 0x64e   : > { %v1353_v9 = vpop.xlane.xlu1 %1352 }
 0x64f   : > { %2816 = vrcp.f32 %v1353_v9 }
 0x650   : > { %v1616_v25 = vpop.permute.xlu0 %1615 }
 0x652   : > { %v1614_v24 = vpop.permute.xlu1 %1613 }
 0x653   : > { %v2811_v10 = vpop.eup %2810 }
 0x654   : > { %v1364_v14 = vmul.f32 %v2811_v10, %v3640_v38  ;;  %v1712_v26 = vpop.permute.xlu0 %1711 }
 0x655   : > { %v2813_v11 = vpop.eup %2812  ;;  %v1726_v30 = vsel %vm1037_vm1, %v1712_v26, 0 }
 0x656   : > { %v2815_v12 = vpop.eup %2814  ;;  %v1367_v13 = vmul.f32 %v2813_v11, %v2799_v39  ;;  %v1368_v19 = vsel %vm1110_vm3, 0.0, %v1364_v14  ;;  %v1618_v27 = vpop.permute.xlu1 %1617 }
 0x657   : > { %v1366_v16 = vmul.f32 %v2815_v12, %v3636_v36 }
 0x658   : > { %v1371_v18 = vsel %vm1110_vm3, 0.0, %v1367_v13  ;;  %v1716_v28 = vpop.permute.xlu0 %1715 }
 0x659   : > { %v2817_v15 = vpop.eup %2816  ;;  %v1370_v22 = vsel %vm1110_vm3, 0.0, %v1366_v16  ;;  %v1732_v33 = vsel %vm1037_vm1, %v1716_v28, 0 }
 0x65a   : > { %v1365_v17 = vmul.f32 %v2817_v15, %v2801_v48  ;;  %v1373_v23 = vpack.c.bf16 %v1371_v18, %v1370_v22  ;;  %v1714_v31 = vpop.permute.xlu1 %1713 }
 0x65b   : > { %v1729_v32 = vsel %vm1037_vm1, %v1714_v31, 0 }
 0x65c   : > { %v1369_v20 = vsel %vm1110_vm3, 0.0, %v1365_v17  ;;  %v1704_v29 = vpop.permute.xlu0 %1703 }
 0x65d   : > { %v1372_v21 = vpack.c.bf16 %v1369_v20, %v1368_v19 }
 0x65e   : > { %v1718_v34 = vpop.permute.xlu1 %1717 }
 0x65f   : > { %2509 = vmatprep.mubr.msk.bf16.mxu1 %vm1115_vm4, %v1372_v21  ;;  %v1735_v35 = vsel %vm1037_vm1, %v1718_v34, 0 }
 0x660   : > { %2510 = vmatmul.mubr.msk.bf16.vlgmr.msra.gmra.mrb[8].mxu1 %vm1115_vm4, %v1373_v23 }
 0x661   : > { %2526 = vmatpush3.bf16.msra.mxu1 %v1612_v8  ;;  %2533 = vmatprep.mubr.msk.bf16.mxu1 %vm1115_vm4, %v1605_v43 }
 0x662   : > { %2527 = vmatprep.subr.bf16.mxu1 %v1614_v24  ;;  %v1706_v36 = vpop.permute.xlu1 %1705 }
 0x665   : > { %2528 = vmatpush3.bf16.msra.mxu1 %v1614_v24 }
 0x666   : > { %2529 = vmatprep.subr.bf16.mxu1 %v1616_v25 }
 0x669   : > { %2530 = vmatpush3.bf16.msra.mxu1 %v1616_v25 }
 0x66a   : > { %2531 = vmatprep.subr.bf16.mxu1 %v1618_v27 }
 0x66d   : > { %2532 = vmatpush3.bf16.msra.mxu1 %v1618_v27 }
 0x66e   : > { %2593 = vmatprep.subr.msk.bf16.mxu1 %vm1037_vm1, %v1712_v26 }
 0x670   : > { %2534 = vmatmul.mubr.msk.bf16.vlgmr.msra.gmra.mrb[12].mxu1 %vm1115_vm4, %v1606_v3 }
 0x671   : > { %2545 = vmatprep.mubr.msk.bf16.mxu1 %vm1037_vm1, %v1704_v29 }
 0x676   : > { %2538 = vmatpush3.bf16.xpose.msra.mxu1 %v1726_v30 }
 0x677   : > { %2594 = vmatprep.subr.msk.bf16.mxu1 %vm1037_vm1, %v1714_v31 }
 0x67e   : > { %2540 = vmatpush3.bf16.xpose.msra.mxu1 %v1729_v32 }
 0x67f   : > { %2595 = vmatprep.subr.msk.bf16.mxu1 %vm1037_vm1, %v1716_v28 }
 0x686   : > { %2542 = vmatpush3.bf16.xpose.msra.mxu1 %v1732_v33 }
 0x687   : > { %2596 = vmatprep.subr.msk.bf16.mxu1 %vm1037_vm1, %v1718_v34 }
 0x68e   : > { %2544 = vmatpush3.bf16.xpose.msra.mxu1 %v1735_v35 }
 0x695   : > { %2546 = vmatmul.mubr.msk.bf16.vlgmr.msra.gmra.mrb[16].mxu1 %vm1037_vm1, %v1706_v36 }
 0x733   : > { %v2511_v37 = vpop.f32.mrb[8].mxu1 }
 0x734   : > { %v1430_v38 = vpop.f32.mrb[9].mxu1 }
 0x735   : > { %v2512_v39 = vpop.f32.mrb[10].mxu1 }
 0x736   : > { %v1446_v45 = vpack.c.bf16 %v2512_v39, %v2511_v37  ;;  %v1433_v47 = vpop.f32.mrb[11].mxu1 }
 0x737   : > { %v1445_v48 = vpack.c.bf16 %v1433_v47, %v1430_v38 }
 0x743   : > { %v2535_v49 = vpop.f32.mrb[12].mxu1 }
 0x744   : > { %v1663_v50 = vpop.f32.mrb[13].mxu1 }
 0x745   : > { %v2536_v51 = vpop.f32.mrb[14].mxu1 }
 0x746   : > { %v1679_v57 = vpack.c.bf16 %v2536_v51, %v2535_v49  ;;  %v1666_v52 = vpop.f32.mrb[15].mxu1  ;;  %v2763_v51 = vld [vmem:[#allocation13 + $0x8] sm:$0xff]  }
 0x747   : > { %v1678_v58 = vpack.c.bf16 %v1666_v52, %v1663_v50  ;;  %v2762_v50 = vld [vmem:[#allocation13] sm:$0xff]   ;;  %v2765_v52 = vld [vmem:[#allocation13 + $0x18] sm:$0xff]  }
 0x768   : > { %v2547_v61 = vpop.f32.mrb[16].mxu1 }
 0x769   : > { %v1771_v53 = vpop.f32.mrb[17].mxu1  ;;  %v1788_v55 = vsel %vm1110_vm3, -1e+30, %v2547_v61  ;;  %v2768_v61 = vld [vmem:[#allocation13 + $0x30] sm:$0xff]  }
 0x76a   : > { %v1786_v63 = vsel %vm1110_vm3, -1e+30, %v1771_v53  ;;  %v2548_v54 = vpop.f32.mrb[18].mxu1  ;;  %v1796_v46 = vsel %vm1115_vm4, %v1788_v55, -inf  ;;  %v2769_v53 = vld [vmem:[#allocation13 + $0x38] sm:$0xff]  }
 0x76b   : > { %v1774_v60 = vpop.f32.mrb[19].mxu1  ;;  %v1790_v1 = vsel %vm1115_vm4, %v1786_v63, -inf  ;;  %v1789_v59 = vsel %vm1110_vm3, -1e+30, %v2548_v54 }
 0x76c   : > { %v1787_v56 = vsel %vm1110_vm3, -1e+30, %v1774_v60  ;;  %1791 = vmax.xlane.f32.xlu0 %v1790_v1  ;;  %v1799_v62 = vsel %vm1115_vm4, %v1789_v59, -inf }
 0x76d   : > { %v1793_v43 = vsel %vm1115_vm4, %v1787_v56, -inf }
 0x76e   : > { %1794 = vmax.xlane.f32.xlu1 %v1793_v43  ;;  %v990_v43 = vld [vmem:[%s988_s8 + $0x8] sm:$0xff] }
 0x770   : > { %1797 = vmax.xlane.f32.xlu0 %v1796_v46  ;;  %v989_v46 = vld [vmem:[%s988_s8] sm:$0xff] }
 0x774   : > { %1800 = vmax.xlane.f32.xlu0 %v1799_v62  ;;  %v992_v62 = vld [vmem:[%s988_s8 + $0x18] sm:$0xff] }
 0x77f   : > { %1846 = vrot.lane.b32.xlu1 %v3516_v41, %s3093_s26 }
 0x783   : > { %1848 = vrot.lane.b32.xlu1 %v3520_v42, %s3093_s26 }
 0x7f9   : > { %v1792_v0 = vpop.xlane.xlu0 %1791 }
 0x7fa   : > { %v1802_v2 = vsub.f32 %v1786_v63, %v1792_v0 }
 0x7fb   : > { %v1795_v3 = vpop.xlane.xlu1 %1794 }
 0x7fc   : > { %v1806_v6 = vmul.f32 1.442695, %v1802_v2  ;;  %v1803_v8 = vsub.f32 %v1787_v56, %v1795_v3 }
 0x7fd   : > { %v1798_v4 = vpop.xlane.xlu0 %1797 }
 0x7fe   : > { %v1804_v5 = vsub.f32 %v1788_v55, %v1798_v4  ;;  %v1808_v12 = vmul.f32 1.442695, %v1803_v8  ;;  %v3756_v8 = vld [vmem:[%s3753_s22 + $0x13] sm:$0xff] }
 0x7ff   : > { %v1847_v20 = vpop.permute.xlu1 %1846 }
 0x800   : > { %v1810_v9 = vmul.f32 1.442695, %v1804_v5  ;;  %v2288_v5 = vld [vmem:[%s3997_s30] ss:$0 sm:$0xff] }
 0x801   : > { %v1801_v10 = vpop.xlane.xlu0 %1800 }
 0x802   : > { %2818 = vpow2.f32 %v1810_v9  ;;  %v1805_v11 = vsub.f32 %v1789_v59, %v1801_v10  ;;  %v991_v59 = vld [vmem:[%s988_s8 + $0x10] sm:$0xff]  ;;  %v2300_v10 = vld [vmem:[%s3998_s18 + $0x2] ss:$0 sm:$0xff] }
 0x803   : > { %2820 = vpow2.f32 %v1806_v6  ;;  %v1849_v21 = vpop.permute.xlu1 %1848  ;;  %v2294_v6 = vld [vmem:[%s3998_s18 + $0x1] ss:$0 sm:$0xff]  ;;  %v3759_v9 = vld [vmem:[%s3753_s22 + $0x14] sm:$0xff] }
 0x804   : > { %v1812_v13 = vmul.f32 1.442695, %v1805_v11  ;;  %v2284_v11 = vld [vmem:[%s3753_s22 + $0x3] sm:$0xff] }
 0x806   : > { %2822 = vpow2.f32 %v1812_v13  ;;  %v792_v13 = vmul.f32 %v3756_v8, %v2288_v5 }
 0x807   : > { %2824 = vpow2.f32 %v1808_v12  ;;  %v2290_v12 = vld [vmem:[%s3753_s22 + $0x4] sm:$0xff] }
 0x80c   : > { %v2819_v41 = vpop.eup %2818 }
 0x80d   : > { %v1820_v14 = vsel %vm1115_vm4, %v2819_v41, 0.0  ;;  %v2821_v42 = vpop.eup %2820 }
 0x80e   : > { %1821 = vadd.xlane.f32.xlu0 %v1820_v14  ;;  %v1814_v16 = vsel %vm1115_vm4, %v2821_v42, 0.0  ;;  %v3769_v14 = vld [vmem:[%s3753_s22 + $0x15] sm:$0xff] }
 0x810   : > { %v2823_v15 = vpop.eup %2822 }
 0x811   : > { %v1823_v17 = vsel %vm1115_vm4, %v2823_v15, 0.0  ;;  %v2825_v18 = vpop.eup %2824 }
 0x812   : > { %1815 = vadd.xlane.f32.xlu0 %v1814_v16  ;;  %1824 = vadd.xlane.f32.xlu1 %v1823_v17  ;;  %v1817_v19 = vsel %vm1115_vm4, %v2825_v18, 0.0  ;;  %v3778_v16 = vld [vmem:[%s3753_s22 + $0xb] sm:$0xff] }
 0x813   : > { %v3781_v17 = vld [vmem:[%s3753_s22 + $0xc] sm:$0xff] }
 0x816   : > { %1818 = vadd.xlane.f32.xlu1 %v1817_v19  ;;  %v809_v19 = vmul.f32 %v2294_v6, %v2290_v12  ;;  %v2320_v12 = vld [vmem:[%s3753_s22 + $0x9] sm:$0xff] }
 0x827   : > { %1850 = vrot.lane.b32.xlu1 %v3528_v44, %s3093_s26 }
 0x828   : > { %1844 = vrot.lane.b32.xlu0 %v3512_v40, %s3093_s26 }
 0x82b   : > { %1451 = vrot.lane.b32.xlu1 %v1446_v45, %s3093_s26 }
 0x82c   : > { %1449 = vrot.lane.b32.xlu0 %v1445_v48, %s3093_s26  ;;  %s4001_s26 = sld [smem:[#allocation29_spill]] }
 0x82f   : > { %1684 = vrot.lane.b32.xlu1 %v1679_v57, %s3092_s21  ;;  %v2764_v57 = vld [vmem:[#allocation13 + $0x10] sm:$0xff]  }
 0x830   : > { %1682 = vrot.lane.b32.xlu0 %v1678_v58, %s3092_s21  ;;  %v2766_v58 = vld [vmem:[#allocation13 + $0x20] sm:$0xff]  }
 0x89b   : > { %v1822_v22 = vpop.xlane.xlu0 %1821 }
 0x89c   : > { %2826 = vrcp.f32 %v1822_v22  ;;  %v830_v22 = vmul.f32 %v3769_v14, %v2300_v10 }
 0x89f   : > { %v1816_v23 = vpop.xlane.xlu0 %1815  ;;  %v1825_v24 = vpop.xlane.xlu1 %1824 }
 0x8a0   : > { %2828 = vrcp.f32 %v1816_v23 }
 0x8a1   : > { %2830 = vrcp.f32 %v1825_v24 }
 0x8a3   : > { %v1845_v44 = vpop.permute.xlu0 %1844  ;;  %v1819_v25 = vpop.xlane.xlu1 %1818 }
 0x8a4   : > { %2832 = vrcp.f32 %v1819_v25  ;;  %2549 = vmatprep.subr.bf16.mxu0 %v1845_v44  ;;  %v791_v25 = vmul.f32 %v2288_v5, %v3778_v16 }
 0x8a5   : > { %2550 = vmatpush3.bf16.msra.mxu0 %v1845_v44  ;;  %v2306_v44 = vld [vmem:[%s3998_s18 + $0x3] ss:$0 sm:$0xff] }
 0x8a6   : > { %2551 = vmatprep.subr.bf16.mxu0 %v1847_v20  ;;  %v2827_v27 = vpop.eup %2826 }
 0x8a7   : > { %v1450_v40 = vpop.permute.xlu0 %1449  ;;  %v1851_v26 = vpop.permute.xlu1 %1850  ;;  %v1832_v35 = vmul.f32 %v2827_v27, %v2819_v41  ;;  %v811_v41 = vmul.f32 %v3759_v9, %v2294_v6  ;;  %v3794_v27 = vld [vmem:[%s3753_s22 + $0x1d] sm:$0xff] }
 0x8a8   : > { %1456 = vst.msk [vmem:[#allocation6] sm:$0xff] %vm1455_vm5, %v1450_v40  ;;  %v810_v40 = vmul.f32 %v2294_v6, %v3781_v17 }
 0x8a9   : > { %2552 = vmatpush3.bf16.msra.mxu0 %v1847_v20  ;;  %v1836_v48 = vsel %vm1110_vm3, 0.0, %v1832_v35  ;;  %v2296_v20 = vld [vmem:[%s3753_s22 + $0x5] sm:$0xff]  ;;  %v831_v35 = vmul.f32 %v3794_v27, %v2300_v10 }
 0x8aa   : > { %v2829_v28 = vpop.eup %2828  ;;  %2553 = vmatprep.subr.bf16.mxu0 %v1849_v21 }
 0x8ab   : > { %v2831_v29 = vpop.eup %2830  ;;  %v1683_v30 = vpop.permute.xlu0 %1682  ;;  %v1830_v33 = vmul.f32 %v2829_v28, %v2821_v42  ;;  %v3772_v42 = vld [vmem:[%s3753_s22 + $0x1b] sm:$0xff]  ;;  %v3797_v28 = vld [vmem:[%s3753_s22 + $0xd] sm:$0xff] }
 0x8ac   : > { %v1452_v31 = vpop.permute.xlu1 %1451  ;;  %v1833_v32 = vmul.f32 %v2831_v29, %v2823_v15  ;;  %1689 = vst.msk [vmem:[#allocation6] sm:$0xff] %vm1688_vm6, %v1683_v30  ;;  %v3775_v15 = vld [vmem:[%s3753_s22 + $0x1c] sm:$0xff]  ;;  %v793_v23 = vmul.f32 %v3772_v42, %v2288_v5  ;;  %v828_v30 = vmul.f32 %v2300_v10, %v2296_v20  ;;  %v2330_v20 = vld [vmem:[%s3998_s18 + $0x7] ss:$0 sm:$0xff] }
 0x8ad   : > { %1457 = vst.msk [vmem:[#allocation6 + $0x8] sm:$0xff] %vm1455_vm5, %v1452_v31  ;;  %2554 = vmatpush3.bf16.msra.mxu0 %v1849_v21  ;;  %v1834_v39 = vsel %vm1110_vm3, 0.0, %v1830_v33  ;;  %v815_v21 = vadd.f32 %v811_v41, %v792_v13  ;;  %v812_v24 = vmul.f32 %v3775_v15, %v2294_v6  ;;  %v2302_v31 = vld [vmem:[%s3753_s22 + $0x6] sm:$0xff]  ;;  %v3829_v6 = vld [vmem:[%s3753_s22 + $0x10] sm:$0xff] }
 0x8ae   : > { %v2833_v34 = vpop.eup %2832  ;;  %2555 = vmatprep.subr.bf16.mxu0 %v1851_v26  ;;  %v1837_v38 = vsel %vm1110_vm3, 0.0, %v1833_v32 }
 0x8af   : > { %v1831_v37 = vmul.f32 %v2833_v34, %v2825_v18  ;;  %v1839_v49 = vpack.c.bf16 %v1837_v38, %v1836_v48  ;;  %v790_v18 = vmul.f32 %v2288_v5, %v2284_v11  ;;  %v834_v32 = vadd.f32 %v830_v22, %v815_v21  ;;  %v3826_v5 = vld [vmem:[%s3753_s22 + $0x20] sm:$0xff] }
 0x8b0   : > { %v1685_v36 = vpop.permute.xlu1 %1684  ;;  %v816_v34 = vadd.f32 %v812_v24, %v793_v23  ;;  %v829_v38 = vmul.f32 %v2300_v10, %v3797_v28  ;;  %v2328_v23 = vld [vmem:[%s3753_s22 + $0x1a] sm:$0xff] }
 0x8b1   : > { %1690 = vst.msk [vmem:[#allocation6 + $0x8] sm:$0xff] %vm1688_vm6, %v1685_v36  ;;  %2556 = vmatpush3.bf16.msra.mxu0 %v1851_v26  ;;  %v1835_v45 = vsel %vm1110_vm3, 0.0, %v1831_v37  ;;  %v2304_v26 = vld [vmem:[%s3753_s22 + $0x16] sm:$0xff]  ;;  %v813_v29 = vadd.f32 %v809_v19, %v790_v18  ;;  %v2312_v36 = vld [vmem:[%s3998_s18 + $0x4] ss:$0 sm:$0xff]  ;;  %v814_v37 = vadd.f32 %v810_v40, %v791_v25 }
 0x8b2   : > { %v1838_v47 = vpack.c.bf16 %v1835_v45, %v1834_v39  ;;  %2561 = vmatprep.subr.bf16.mxu0 %v2762_v50  ;;  %v849_v33 = vmul.f32 %v2306_v44, %v2304_v26  ;;  %v2310_v39 = vld [vmem:[%s3753_s22 + $0x17] sm:$0xff]  ;;  %v2323_v24 = vld [vmem:[%s3753_s22 + $0x21] sm:$0xff]  ;;  %v2326_v26 = vld [vmem:[%s3753_s22 + $0xa] sm:$0xff] }
 0x8b3   : > { %v2305_v45 = vld [vmem:[%s3753_s22 + $0x1e] sm:$0xff]  ;;  %v832_v48 = vadd.f32 %v828_v30, %v813_v29  ;;  %v925_v30 = vmul.f32 %v2330_v20, %v2328_v23 }
 0x8b4   : > { %2557 = vmatprep.mubr.msk.bf16.mxu0 %vm1115_vm4, %v1838_v47  ;;  %v2303_v47 = vld [vmem:[%s3753_s22 + $0xe] sm:$0xff] }
 0x8b5   : > { %2558 = vmatmul.mubr.msk.bf16.vlgmr.msra.gmra.mrb[8].mxu0 %vm1115_vm4, %v1839_v49  ;;  %v847_v49 = vmul.f32 %v2306_v44, %v2302_v31 }
 0x8b6   : > { %2562 = vmatpush3.bf16.msra.mxu0 %v2762_v50  ;;  %v2308_v50 = vld [vmem:[%s3753_s22 + $0x7] sm:$0xff] }
 0x8b7   : > { %2563 = vmatprep.subr.bf16.mxu0 %v2763_v51 }
 0x8ba   : > { %2564 = vmatpush3.bf16.msra.mxu0 %v2763_v51  ;;  %v853_v51 = vadd.f32 %v849_v33, %v834_v32  ;;  %v2336_v33 = vld [vmem:[%s3998_s18 + $0x8] ss:$0 sm:$0xff] }
 0x8bb   : > { %2565 = vmatprep.subr.bf16.mxu0 %v2764_v57 }
 0x8be   : > { %2566 = vmatpush3.bf16.msra.mxu0 %v2764_v57  ;;  %v868_v57 = vmul.f32 %v2312_v36, %v2310_v39  ;;  %v923_v39 = vmul.f32 %v2330_v20, %v2326_v26 }
 0x8bf   : > { %2567 = vmatprep.subr.bf16.mxu0 %v2765_v52 }
 0x8c2   : > { %2568 = vmatpush3.bf16.msra.mxu0 %v2765_v52  ;;  %v835_v52 = vadd.f32 %v831_v35, %v816_v34 }
 0x8c3   : > { %2569 = vmatprep.subr.bf16.mxu0 %v2766_v58 }
 0x8c6   : > { %2570 = vmatpush3.bf16.msra.mxu0 %v2766_v58  ;;  %v850_v58 = vmul.f32 %v2306_v44, %v2305_v45 }
 0x8c7   : > { %2571 = vmatprep.subr.bf16.mxu0 %v2767_v7 }
 0x8ca   : > { %2572 = vmatpush3.bf16.msra.mxu0 %v2767_v7  ;;  %v2318_v7 = vld [vmem:[%s3998_s18 + $0x5] ss:$0 sm:$0xff] }
 0x8cb   : > { %2573 = vmatprep.subr.bf16.mxu0 %v2768_v61  ;;  %v888_v19 = vmul.f32 %v2318_v7, %v3826_v5  ;;  %v886_v22 = vmul.f32 %v2318_v7, %v3829_v6 }
 0x8ce   : > { %2574 = vmatpush3.bf16.msra.mxu0 %v2768_v61  ;;  %v833_v61 = vadd.f32 %v829_v38, %v814_v37  ;;  %v2327_v37 = vld [vmem:[%s3753_s22 + $0x12] sm:$0xff] }
 0x8cf   : > { %2575 = vmatprep.subr.bf16.mxu0 %v2769_v53 }
 0x8d2   : > { %2576 = vmatpush3.bf16.msra.mxu0 %v2769_v53  ;;  %v848_v53 = vmul.f32 %v2306_v44, %v2303_v47  ;;  %v2321_v44 = vld [vmem:[%s3753_s22 + $0x11] sm:$0xff]  ;;  %v944_v47 = vmul.f32 %v2336_v33, %v3772_v42  ;;  %v2348_v42 = vld [vmem:[%s3998_s18 + $0xa] ss:$0 sm:$0xff] }
 0x988   : > { %v2559_v63 = vpop.f32.mrb[8].mxu0 }
 0x989   : > { %v1896_v54 = vpop.f32.mrb[9].mxu0 }
 0x98a   : > { %v2560_v60 = vpop.f32.mrb[10].mxu0 }
 0x98b   : > { %v1912_v1 = vpack.c.bf16 %v2560_v60, %v2559_v63  ;;  %v1899_v55 = vpop.f32.mrb[11].mxu0  ;;  %v3813_v63 = vld [vmem:[%s3753_s22 + $0x18] sm:$0xff]  ;;  %v2309_v60 = vld [vmem:[%s3753_s22 + $0xf] sm:$0xff] }
 0x98c   : > { %v1911_v56 = vpack.c.bf16 %v1899_v55, %v1896_v54  ;;  %v2311_v54 = vld [vmem:[%s3753_s22 + $0x1f] sm:$0xff]  ;;  %v866_v55 = vmul.f32 %v2312_v36, %v2308_v50  ;;  %v2342_v50 = vld [vmem:[%s3998_s18 + $0x9] ss:$0 sm:$0xff] }
 0x98d   : > { %1917 = vrot.lane.b32.xlu1 %v1912_v1, %s3091_s25  ;;  %v851_v1 = vadd.f32 %v847_v49, %v832_v48 }
 0x98e   : > { %1915 = vrot.lane.b32.xlu0 %v1911_v56, %s3091_s25  ;;  %v3818_v56 = vld [vmem:[%s3753_s22 + $0x8] sm:$0xff]  ;;  %s4000_s25 = sld [smem:[#allocation22_spill]] }
 0x98f   : > { %v870_v10 = vadd.f32 %v866_v55, %v851_v1  ;;  %v885_v11 = vmul.f32 %v2318_v7, %v3818_v56  ;;  %v943_v55 = vmul.f32 %v2336_v33, %v3756_v8 }
 0x991   : > { %1004 = vperm.xlu1 %2761, %v990_v43   ;;  %v872_v43 = vadd.f32 %v868_v57, %v853_v51  ;;  %v889_v25 = vadd.f32 %v885_v11, %v870_v10  ;;  %v924_v57 = vmul.f32 %v2330_v20, %v2327_v37 }
 0x992   : > { %999 = vperm.xlu0 %2760, %v989_v46   ;;  %v887_v46 = vmul.f32 %v2318_v7, %v3813_v63  ;;  %v942_v7 = vmul.f32 %v2336_v33, %v3778_v16  ;;  %v982_v16 = vmul.f32 %v2348_v42, %v3794_v27 }
 0x994   : > { %v891_v13 = vadd.f32 %v887_v46, %v872_v43  ;;  %v2341_v43 = vld [vmem:[%s3753_s22 + $0x24] sm:$0xff]  ;;  %p4002_p13 = scmp.ne.s32.totalorder %s4000_s25, 0 }
 0x995   : > { %1009 = vperm.xlu1 %2761, %v991_v59   ;;  %v854_v59 = vadd.f32 %v850_v58, %v835_v52  ;;  %v2335_v52 = vld [vmem:[%s3753_s22 + $0x23] sm:$0xff] }
 0x996   : > { %1014 = vperm.xlu0 %2760, %v992_v62   ;;  %v869_v62 = vmul.f32 %v2312_v36, %v2311_v54 }
 0x998   : > { %v873_v18 = vadd.f32 %v869_v62, %v854_v59  ;;  %v961_v59 = vmul.f32 %v2342_v50, %v3781_v17  ;;  %v981_v17 = vmul.f32 %v2348_v42, %v3769_v14 }
 0x99a   : > { %v892_v31 = vadd.f32 %v888_v19, %v873_v18 }
 0x9ff   : > { %v1918_v0 = vpop.permute.xlu1 %1917 }
 0xa00   : > { %1923 = vst.msk [vmem:[#allocation6 + $0x8] sm:$0xff] %vm1921_vm7, %v1918_v0  ;;  %v1916_v2 = vpop.permute.xlu0 %1915  ;;  %v2324_v0 = vld [vmem:[%s3998_s18 + $0x6] ss:$0 sm:$0xff] }
 0xa01   : > { %1922 = vst.msk [vmem:[#allocation6] sm:$0xff] %vm1921_vm7, %v1916_v2  ;;  %v852_v2 = vadd.f32 %v848_v53, %v833_v61  ;;  %v904_v40 = vmul.f32 %v2324_v0, %v2320_v12  ;;  %v907_v32 = vmul.f32 %v2324_v0, %v2323_v24  ;;  %v905_v35 = vmul.f32 %v2324_v0, %v2321_v44 }
 0xa02   : > { %v963_v53 = vmul.f32 %v2342_v50, %v3775_v15  ;;  %v962_v15 = vmul.f32 %v2342_v50, %v3759_v9  ;;  %v980_v12 = vmul.f32 %v2348_v42, %v3797_v28  ;;  %v2366_v28 = vld [vmem:[%s3999_s19] ss:$0 sm:$0xff] }
 0xa03   : > { %v908_v38 = vadd.f32 %v904_v40, %v889_v25  ;;  %v911_v48 = vadd.f32 %v907_v32, %v892_v31 }
 0xa05   : > { %v927_v58 = vadd.f32 %v923_v39, %v908_v38 }
 0xa07   : > { %v1925_v4 = vld [vmem:[#allocation6 + $0x8] sm:$0xff]  ;;  %v946_v46 = vadd.f32 %v942_v7, %v927_v58 }
 0xa08   : > { %v1924_v3 = vld [vmem:[#allocation6] sm:$0xff] }
 0xa09   : > { %2577 = vmatprep.mubr.bf16.mxu0 %v1924_v3  ;;  %v867_v3 = vmul.f32 %v2312_v36, %v2309_v60  ;;  %v2329_v36 = vld [vmem:[%s3753_s22 + $0x22] sm:$0xff]  ;;  %v945_v60 = vmul.f32 %v2336_v33, %v2335_v52  ;;  %v965_v11 = vadd.f32 %v961_v59, %v946_v46 }
 0xa0a   : > { %2578 = vmatmul.mubr.bf16.vlgmr.msra.gmra.mrb[12].mxu0 %v1925_v4  ;;  %v2322_v4 = vld [vmem:[%s3753_s22 + $0x19] sm:$0xff]  ;;  %v926_v49 = vmul.f32 %v2330_v20, %v2329_v36 }
 0xa0b   : > { %v906_v41 = vmul.f32 %v2324_v0, %v2322_v4  ;;  %v871_v21 = vadd.f32 %v867_v3, %v852_v2  ;;  %v964_v2 = vmul.f32 %v2342_v50, %v2341_v43  ;;  %v2347_v4 = vld [vmem:[%s3753_s22 + $0x25] sm:$0xff]  ;;  %v984_v27 = vadd.f32 %v980_v12, %v965_v11  ;;  %s2377_s22 = sshll.u32 %s3066_s12, 3 }
 0xa0c   : > { %v930_v54 = vadd.f32 %v926_v49, %v911_v48  ;;  %s2067_s23 = sadd.s32 %s2377_s22, %s2376_s17  ;;  %s2948_s17 = scalar_lea.vmem %s3881_s16, 512 }
 0xa0d   : > { %v910_v29 = vadd.f32 %v906_v41, %v891_v13  ;;  %v890_v34 = vadd.f32 %v886_v22, %v871_v21  ;;  %v983_v41 = vmul.f32 %v2348_v42, %v2347_v4  ;;  %v993_v23 = vadd.f32 %v3818_v56, %v984_v27  ;;  %s2378_s12 = sshll.u32 %s2067_s23, 7  ;;  %p2949_p4 = scmp.ne.s32.totalorder %s3881_s16, %s2948_s17 }
 0xa0e   : > { %v949_v0 = vadd.f32 %v945_v60, %v930_v54  ;;  %s3879_s8 = scalar_lea.hbm %s4001_s26, %s2378_s12  ;;  %s3094_s22 = smov [#allocation15]  }
 0xa0f   : > { %v929_v45 = vadd.f32 %v925_v30, %v910_v29  ;;  %v909_v51 = vadd.f32 %v905_v35, %v890_v34  ;;  %p2950_p6 = pnand %p2949_p4, %p4002_p13  ;;  %s2952_s30 = sshll.u32 %s3094_s22, 4  ;;  %s2953_s30 = int_to_ptr.vmem [resolvable:$false] %s2952_s30 }
 0xa10   : > { %v1005_v10 = vpop.permute.xlu1 %1004  ;;  %v968_v13 = vadd.f32 %v964_v2, %v949_v0  ;;  %s2954_s3 = scalar_lea.vmem %s2953_s30, 1024  ;;  %p2955_p11 = scmp.lt.s32.totalorder %s3881_s16, %s2953_s30 }
 0xa11   : > { %v948_v61 = vadd.f32 %v944_v47, %v929_v45  ;;  %v928_v1 = vadd.f32 %v924_v57, %v909_v51  ;;  %v1000_v19 = vpop.permute.xlu0 %999  ;;  %p2951_p10 = pneg %p2950_p6  ;;  %p2956_p5 = scmp.lt.s32.totalorder %s2954_s3, %s2948_s17 }
 0xa12   : > { %v987_v21 = vadd.f32 %v983_v41, %v968_v13  ;;  %v1017_v29 = vmul.f32 %v1000_v19, %v993_v23 }
 0xa13   : > { %v967_v62 = vadd.f32 %v963_v53, %v948_v61  ;;  %v947_v3 = vadd.f32 %v943_v55, %v928_v1  ;;  %p2957_p8 = por %p2956_p5, %p2955_p11 }
 0xa14   : > { %v1010_v9 = vpop.permute.xlu1 %1009  ;;  %v996_v44 = vadd.f32 %v3826_v5, %v987_v21 }
 0xa15   : > { %v986_v8 = vadd.f32 %v982_v16, %v967_v62  ;;  %v966_v18 = vadd.f32 %v962_v15, %v947_v3  ;;  %v1015_v25 = vpop.permute.xlu0 %1014  ;;  %p2958_p12 = pnand %p2957_p8, %p2951_p10 }
 0xa16   : > { %v1020_v56 = vmul.f32 %v1015_v25, %v996_v44 }
 0xa17   : > { %v995_v20 = vadd.f32 %v3813_v63, %v986_v8  ;;  %v985_v22 = vadd.f32 %v981_v17, %v966_v18 }
 0xa19   : > { %v1019_v24 = vmul.f32 %v1010_v9, %v995_v20  ;;  %v994_v14 = vadd.f32 %v3829_v6, %v985_v22 }
 0xa1b   : > { %v1018_v6 = vmul.f32 %v1005_v10, %v994_v14 }
 0xadd   : > { %v2579_v63 = vpop.f32.mrb[12].mxu0 }
 0xade   : > { %v2040_v40 = vadd.f32 %v2579_v63, %v2366_v28  ;;  %v2031_v26 = vpop.f32.mrb[13].mxu0 }
 0xadf   : > { %v2032_v30 = vadd.f32 %v2366_v28, %v2031_v26  ;;  %v2580_v31 = vpop.f32.mrb[14].mxu0 }
 0xae0   : > { %v2048_v32 = vadd.f32 %v2040_v40, %v1019_v24  ;;  %v2043_v5 = vadd.f32 %v2580_v31, %v2366_v28  ;;  %v2034_v33 = vpop.f32.mrb[15].mxu0 }
 0xae1   : > { %v2046_v34 = vadd.f32 %v2032_v30, %v1017_v29  ;;  %v2035_v35 = vadd.f32 %v2366_v28, %v2034_v33 }
 0xae2   : > { %2052 = vst [vmem:[%s3403_s5 + $0x10] sm:$0xff] %v2048_v32  ;;  %v2049_v36 = vadd.f32 %v2043_v5, %v1020_v56 }
 0xae3   : > { %2050 = vst [vmem:[%s3403_s5] sm:$0xff] %v2046_v34  ;;  %v2047_v37 = vadd.f32 %v2035_v35, %v1018_v6 }
 0xae4   : > { %2053 = vst [vmem:[%s3403_s5 + $0x18] sm:$0xff] %v2049_v36 }
 0xae5   : > { %2051 = vst [vmem:[%s3403_s5 + $0x8] sm:$0xff] %v2047_v37 }
 0xae6   : > { %2961 = shalt.err (!%p2958_p12)
}
 0xae7   : > { %s2962_s4 = scalar_lea.hbm %s3879_s8, 512  ;;  %s2966_s23 = scalar_lea.hbm %s4001_s26, 2048 }
 0xae8   : > { %p2963_p2 = scmp.ne.s32.totalorder %s3879_s8, %s2962_s4  ;;  %p2967_p0 = scmp.lt.u32.totalorder %s3879_s8, %s4001_s26 }
 0xae9   : > { %p2968_p3 = scmp.lt.u32.totalorder %s2966_s23, %s2962_s4  ;;  %p2970_p4 = scmp.lt.u32.totalorder %s2962_s4, %s3879_s8 }
 0xaea   : > { %p2964_p9 = pnand %p2963_p2, %p4002_p13 }
 0xaeb   : > { %p2969_p1 = por %p2968_p3, %p2967_p0 }
 0xaec   : > { %p2965_p7 = pneg %p2964_p9 }
 0xaed   : > { %p2971_p6 = por %p2970_p4, %p2969_p1 }
 0xaef   : > { %p2972_p10 = pnand %p2971_p6, %p2965_p7 }
 0xaf1   : > { %2975 = shalt.err (!%p2972_p10)
}
 0xaf2   : > { %s3095_s21 = smov 128   ;;  %s3096_s17 = smov 8  }
 0xaf3   : > { %2611 = dma.vmem_to_hbm [thread:$0]  (%p4002_p13), %s3881_s16, 512, %s3879_s8, %s3888_s24, %s3095_s21, %s3095_s21, %s3096_s17  }
 0xaf4 PF: > { %s4003_s22 = sld [smem:[#allocation20_spill]]  ;;  %s4004_s30 = sld [smem:[#allocation23_spill]] }
 0xaf5   : > { %p2638_p11 = scmp.ge.s32.totalorder %s3078_s15, 2 }
 0xafa   : > { %s2085_s3 = sand.u32 1, %s4003_s22   ;;  %p4005_p5 = scmp.ne.s32.totalorder %s4004_s30, 0 }
 0xafb   : > { %s2086_s4 = scalar_lea.sflag [#allocation9], %s2085_s3 }
 0xafc   : > { %p2628_p8 = pnand %p2638_p11, %p4005_p5 }
 0xafe   : > { %3033 = dma.done.wait (!%p2628_p8), %s2086_s4, 512  }
 0xaff   : > { %3035 = vsyncadd (!%p2628_p8), %s2086_s4, 4294966784  ;;  %s26_s15 = sadd.s32 1, %s3078_s15   ;;  %s4006_s16 = smov %s4019_s11 }
 0xb00   : > { %p23_p12 = scmp.ge.s32.totalorder %s26_s15, 6   ;;  %s4007_s25 = smov %s4023_s27 }
 0xb01   : > { %s4008_s27 = smov %s3042_s28  ;;  %s4009_s28 = smov %s3046_s29 }
 0xb02   : > { %s4010_s29 = smov %s3334_s7  ;;  %s4011_s30 = smov %s3054_s9 }
 0xb03   : > { %s4012_s9 = smov %s3058_s10  ;;  %s4013_s10 = smov %s3331_s1 }
 0xb04   : > { %s4014_s11 = smov %s3070_s13  ;;  %s4015_s12 = smov %s3074_s14 }
 0xb05   : > { %s4016_s13 = smov %s4006_s16  ;;  %s4017_s14 = smov %s4007_s25 }
 0xb06   :  { %25 = sbr.rel (!%p23_p12) target bundleno = 18 (0x12), region = 132 }
 0xb0d   :  { %2091 = vsyncpa [#allocation8], 1 }
 0xb0e   :  { %2093 = vsyncpa [#allocation8 + $0x1], 1 }
 0xb0f   :  { %2094 = vsyncpa [#allocation11], 1 }
 0xb10   :  { %2095 = vsyncpa [#allocation14], 1 }
 0xb11   :  { %2096 = vsyncpa [#allocation9], 1 }
 0xb12   :  { %2098 = vsyncpa [#allocation9 + $0x1], 1 }

</bundles_post_ra>
